<compile_context>
chip_gen: v6e
topology: v6e:2x2x1
jax: 0.10.0
libtpu: 0.0.40
codegen_flags: <defaults>
</compile_context>

<pallas_src>
import jax
import jax.numpy as jnp
from jax.experimental import pallas as pl
from jax.experimental.pallas import tpu as pltpu

IN_FEATURES = 28 * 28          # 784
HIDDEN = 512
OUT_FEATURES = 10
OUT_PAD = 128                  # lane-dense output block


def _round_up(x, m):
    return (x + m - 1) // m * m


def _device_kind():
    try:
        return jax.devices()[0].device_kind.lower()
    except Exception:
        return ""


def _tm_max_for_device():
    kind = _device_kind()
    # v5e (197 TF/s bf16): TM=256 already keeps the ~0.35us/step overhead <20%,
    # larger tiles only grow f32 intermediates / per-step DMA.
    if "v5 lite" in kind or "v5e" in kind or "v5litepod" in kind:
        return 256
    # v6e / v7x: bigger tiles amortize per-step overhead.
    return 512


def _num_tensorcores():
    kind = _device_kind()
    # v4 / v7x expose 2 TensorCores per chip; keep grid length >= 2 there so
    # the "parallel" batch axis can be split across both cores.
    return 2 if ("v7" in kind or "v4" in kind) else 1


def _choose_tm(batch, tm_max, n_cores):
    b8 = _round_up(max(batch, 1), 8)
    n_tiles = max(1, -(-b8 // tm_max))                 # ceil(b8 / tm_max)
    if n_cores > 1 and b8 >= 256:
        n_tiles = max(n_tiles, n_cores)                # work for every core
    # Adaptive TM: batch-pad waste stays under one sublane group (8 rows).
    return _round_up(-(-b8 // n_tiles), 8)


def mlp_kernel(x_ref, w1_ref, b1_ref, w2_ref, b2_ref, w3_ref, b3_ref, o_ref):
    # x_ref: (TM, 784) f32; w1: (784, 512) bf16; w2: (512, 512) bf16;
    # w3: (512, 128) bf16 (cols 10..127 zero); biases f32; out (TM, 128) f32.
    # Fused flatten/cast: bf16 cast happens in VMEM, no HBM copy of bf16 x.
    x = x_ref[...].astype(jnp.bfloat16)

    h1 = jnp.dot(x, w1_ref[...], preferred_element_type=jnp.float32) + b1_ref[...]
    h1 = jnp.maximum(h1, 0.0).astype(jnp.bfloat16)

    h2 = jnp.dot(h1, w2_ref[...], preferred_element_type=jnp.float32) + b2_ref[...]
    h2 = jnp.maximum(h2, 0.0).astype(jnp.bfloat16)

    logits = jnp.dot(h2, w3_ref[...], preferred_element_type=jnp.float32) + b3_ref[...]
    o_ref[...] = logits.astype(o_ref.dtype)


def prepare_params(params_f32):
    """f32 (in, out) params -> bf16 weights + f32 biases for the kernel."""
    w1, b1, w2, b2, w3, b3 = params_f32
    w1p = w1.astype(jnp.bfloat16)                      # (784, 512), unpadded K
    w2p = w2.astype(jnp.bfloat16)
    # Pad N: 10 -> 128 (zero cols -> padded logits are exactly b3_pad = 0).
    w3p = jnp.pad(w3, ((0, 0), (0, OUT_PAD - OUT_FEATURES))).astype(jnp.bfloat16)
    b1p = b1.astype(jnp.float32)
    b2p = b2.astype(jnp.float32)
    b3p = jnp.pad(b3, ((0, 0), (0, OUT_PAD - OUT_FEATURES))).astype(jnp.float32)
    return (w1p, b1p, w2p, b2p, w3p, b3p)


@jax.jit
def neural_network_forward(x_nchw, kernel_params):
    """x_nchw: (B, 1, 28, 28) float32 -> logits (B, 10) float32."""
    w1, b1, w2, b2, w3, b3 = kernel_params
    B = x_nchw.shape[0]

    # nn.Flatten: free reshape; the kernel reads these f32 rows directly.
    x_flat = x_nchw.reshape(B, IN_FEATURES)

    TM = _choose_tm(B, _tm_max_for_device(), _num_tensorcores())
    B_pad = _round_up(B, TM)
    if B_pad != B:
        x_flat = jnp.pad(x_flat, ((0, B_pad - B), (0, 0)))
    grid = (B_pad // TM,)

    # Grid-invariant weights/biases: constant index_map -> loaded once, stay
    # resident in VMEM across all batch-grid steps.
    const = lambda arr: pl.BlockSpec(arr.shape, lambda i: (0,) * arr.ndim)

    flops = 2 * B_pad * (IN_FEATURES * HIDDEN + HIDDEN * HIDDEN + HIDDEN * OUT_PAD)
    bytes_accessed = (
        B_pad * IN_FEATURES * 4                          # f32 x read
        + (w1.size + w2.size + w3.size) * 2              # bf16 weights
        + (b1.size + b2.size + b3.size) * 4              # f32 biases
        + B_pad * OUT_PAD * 4                            # f32 logits written
    )

    out = pl.pallas_call(
        mlp_kernel,
        out_shape=jax.ShapeDtypeStruct((B_pad, OUT_PAD), jnp.float32),
        grid_spec=pltpu.PrefetchScalarGridSpec(
            num_scalar_prefetch=0,
            grid=grid,
            in_specs=[
                pl.BlockSpec((TM, IN_FEATURES), lambda i: (i, 0)),
                const(w1), const(b1),
                const(w2), const(b2),
                const(w3), const(b3),
            ],
            out_specs=pl.BlockSpec((TM, OUT_PAD), lambda i: (i, 0)),
        ),
        compiler_params=pltpu.CompilerParams(
            dimension_semantics=("parallel",),
            vmem_limit_bytes=32 << 20,
        ),
        cost_estimate=pl.CostEstimate(
            flops=flops, transcendentals=0, bytes_accessed=bytes_accessed
        ),
    )(x_flat, w1, b1, w2, b2, w3, b3)

    return out[:B, :OUT_FEATURES]


def init_params(key):
    """Deterministic init mimicking PyTorch nn.Linear default:
    U(-1/sqrt(fan_in), 1/sqrt(fan_in)). Weights stored as (in, out)."""
    def linear(k, fan_in, fan_out):
        kw, kb = jax.random.split(k)
        bound = 1.0 / jnp.sqrt(fan_in)
        w = jax.random.uniform(kw, (fan_in, fan_out), jnp.float32, -bound, bound)
        b = jax.random.uniform(kb, (1, fan_out), jnp.float32, -bound, bound)
        return w, b

    k1, k2, k3 = jax.random.split(key, 3)
    w1, b1 = linear(k1, IN_FEATURES, HIDDEN)
    w2, b2 = linear(k2, HIDDEN, HIDDEN)
    w3, b3 = linear(k3, HIDDEN, OUT_FEATURES)
    return (w1, b1, w2, b2, w3, b3)


def reference_forward_f32(x_nchw, params):
    w1, b1, w2, b2, w3, b3 = params
    x = x_nchw.reshape(x_nchw.shape[0], -1)
    h = jnp.maximum(x @ w1 + b1, 0.0)
    h = jnp.maximum(h @ w2 + b2, 0.0)
    return h @ w3 + b3


def reference_forward_bf16(x_nchw, params):
    """Same precision policy as the kernel (bf16 operands, f32 accumulation)."""
    w1, b1, w2, b2, w3, b3 = params
    x = x_nchw.reshape(x_nchw.shape[0], -1).astype(jnp.bfloat16)
    dot = lambda a, b: jnp.dot(a, b.astype(jnp.bfloat16),
                               preferred_element_type=jnp.float32)
    h = jnp.maximum(dot(x, w1) + b1, 0.0).astype(jnp.bfloat16)
    h = jnp.maximum(dot(h, w2) + b2, 0.0).astype(jnp.bfloat16)
    return dot(h, w3) + b3


if __name__ == "__main__":
    key = jax.random.PRNGKey(0)
    k_params, k_x = jax.random.split(key)

    params_f32 = init_params(k_params)
    kernel_params = prepare_params(params_f32)

    # Small batch of MNIST-shaped inputs (NCHW, like PyTorch).
    x = jax.random.normal(k_x, (8, 1, 28, 28), dtype=jnp.float32)

    logits = neural_network_forward(x, kernel_params)
    logits = jax.block_until_ready(logits)
    assert logits.shape == (8, 10)

    # Tight check vs a reference using the same bf16/f32 precision policy.
    ref_bf16 = reference_forward_bf16(x, params_f32)
    assert jnp.allclose(logits, ref_bf16, atol=2e-2, rtol=2e-2)

    # Loose check vs the pure-f32 PyTorch-equivalent forward (bf16 weights
    # introduce ~0.4% relative rounding).
    ref_f32 = reference_forward_f32(x, params_f32)
    assert jnp.allclose(logits, ref_f32, atol=1e-1, rtol=5e-2)

    print("KERNEL_OK")
</pallas_src>

<mosaic_0001>
module attributes {stable_mosaic.version = 11 : i64} {
  func.func @mlp_kernel(%arg0: i32, %arg1: memref<8x784xf32, #tpu.memory_space<vmem>>, %arg2: memref<784x512xbf16, #tpu.memory_space<vmem>>, %arg3: memref<1x512xf32, #tpu.memory_space<vmem>>, %arg4: memref<512x512xbf16, #tpu.memory_space<vmem>>, %arg5: memref<1x512xf32, #tpu.memory_space<vmem>>, %arg6: memref<512x128xbf16, #tpu.memory_space<vmem>>, %arg7: memref<1x128xf32, #tpu.memory_space<vmem>>, %arg8: memref<8x128xf32, #tpu.memory_space<vmem>>) attributes {dimension_semantics = [#tpu.dimension_semantics<parallel>], iteration_bounds = array<i64: 1>, scalar_prefetch = 0 : i64, scratch_operands = 0 : i64, tpu.core_type = #tpu.core_type<tc>, window_params = [{transform_indices = @transform_0, window_bounds = array<i64: 8, 784>}, {pipeline_mode = #tpu.pipeline_mode<synchronous>, transform_indices = @transform_1, window_bounds = array<i64: 784, 512>}, {pipeline_mode = #tpu.pipeline_mode<synchronous>, transform_indices = @transform_2, window_bounds = array<i64: 1, 512>}, {pipeline_mode = #tpu.pipeline_mode<synchronous>, transform_indices = @transform_3, window_bounds = array<i64: 512, 512>}, {pipeline_mode = #tpu.pipeline_mode<synchronous>, transform_indices = @transform_4, window_bounds = array<i64: 1, 512>}, {pipeline_mode = #tpu.pipeline_mode<synchronous>, transform_indices = @transform_5, window_bounds = array<i64: 512, 128>}, {pipeline_mode = #tpu.pipeline_mode<synchronous>, transform_indices = @transform_6, window_bounds = array<i64: 1, 128>}, {transform_indices = @transform_7, window_bounds = array<i64: 8, 128>}]} {
    %c0 = arith.constant 0 : index
    %c0_0 = arith.constant 0 : index
    %0 = vector.load %arg1[%c0, %c0_0] : memref<8x784xf32, #tpu.memory_space<vmem>>, vector<8x784xf32>
    %1 = arith.truncf %0 : vector<8x784xf32> to vector<8x784xbf16>
    %c0_1 = arith.constant 0 : index
    %c0_2 = arith.constant 0 : index
    %2 = vector.load %arg2[%c0_1, %c0_2] : memref<784x512xbf16, #tpu.memory_space<vmem>>, vector<784x512xbf16>
    %cst = arith.constant dense<0.000000e+00> : vector<8x512xf32>
    %3 = tpu.matmul %1, %2, %cst {dimension_numbers = #tpu.dot_dimension_numbers<[1], [0], [0], [1], [0, 0, 1, 1], [], []>} : vector<8x784xbf16>, vector<784x512xbf16>, vector<8x512xf32> -> vector<8x512xf32>
    %c0_3 = arith.constant 0 : index
    %c0_4 = arith.constant 0 : index
    %4 = vector.load %arg3[%c0_3, %c0_4] : memref<1x512xf32, #tpu.memory_space<vmem>>, vector<1x512xf32>
    %5 = vector.broadcast %4 : vector<1x512xf32> to vector<8x512xf32>
    %6 = arith.addf %3, %5 : vector<8x512xf32>
    %cst_5 = arith.constant 0.000000e+00 : f32
    %7 = vector.broadcast %cst_5 : f32 to vector<8x512xf32>
    %8 = arith.maximumf %6, %7 : vector<8x512xf32>
    %9 = arith.truncf %8 : vector<8x512xf32> to vector<8x512xbf16>
    %c0_6 = arith.constant 0 : index
    %c0_7 = arith.constant 0 : index
    %10 = vector.load %arg4[%c0_6, %c0_7] : memref<512x512xbf16, #tpu.memory_space<vmem>>, vector<512x512xbf16>
    %cst_8 = arith.constant dense<0.000000e+00> : vector<8x512xf32>
    %11 = tpu.matmul %9, %10, %cst_8 {dimension_numbers = #tpu.dot_dimension_numbers<[1], [0], [0], [1], [0, 0, 1, 1], [], []>} : vector<8x512xbf16>, vector<512x512xbf16>, vector<8x512xf32> -> vector<8x512xf32>
    %c0_9 = arith.constant 0 : index
    %c0_10 = arith.constant 0 : index
    %12 = vector.load %arg5[%c0_9, %c0_10] : memref<1x512xf32, #tpu.memory_space<vmem>>, vector<1x512xf32>
    %13 = vector.broadcast %12 : vector<1x512xf32> to vector<8x512xf32>
    %14 = arith.addf %11, %13 : vector<8x512xf32>
    %cst_11 = arith.constant 0.000000e+00 : f32
    %15 = vector.broadcast %cst_11 : f32 to vector<8x512xf32>
    %16 = arith.maximumf %14, %15 : vector<8x512xf32>
    %17 = arith.truncf %16 : vector<8x512xf32> to vector<8x512xbf16>
    %c0_12 = arith.constant 0 : index
    %c0_13 = arith.constant 0 : index
    %18 = vector.load %arg6[%c0_12, %c0_13] : memref<512x128xbf16, #tpu.memory_space<vmem>>, vector<512x128xbf16>
    %cst_14 = arith.constant dense<0.000000e+00> : vector<8x128xf32>
    %19 = tpu.matmul %17, %18, %cst_14 {dimension_numbers = #tpu.dot_dimension_numbers<[1], [0], [0], [1], [0, 0, 1, 1], [], []>} : vector<8x512xbf16>, vector<512x128xbf16>, vector<8x128xf32> -> vector<8x128xf32>
    %c0_15 = arith.constant 0 : index
    %c0_16 = arith.constant 0 : index
    %20 = vector.load %arg7[%c0_15, %c0_16] : memref<1x128xf32, #tpu.memory_space<vmem>>, vector<1x128xf32>
    %21 = vector.broadcast %20 : vector<1x128xf32> to vector<8x128xf32>
    %22 = arith.addf %19, %21 : vector<8x128xf32>
    %c0_17 = arith.constant 0 : index
    %c0_18 = arith.constant 0 : index
    %23 = vector.load %arg8[%c0_17, %c0_18] : memref<8x128xf32, #tpu.memory_space<vmem>>, vector<8x128xf32>
    tpu.vector_store %arg8[%c0_17, %c0_18], %22 {strides = array<i32>} : memref<8x128xf32, #tpu.memory_space<vmem>>, vector<8x128xf32>,
    return
  }
  func.func @transform_0(%arg0: i32) -> (i32, i32) {
    %c0_i32 = arith.constant 0 : i32
    %c0_i32_0 = arith.constant 0 : i32
    return %arg0, %c0_i32 : i32, i32
  }
  func.func @transform_1(%arg0: i32) -> (i32, i32) {
    %c0_i32 = arith.constant 0 : i32
    %c0_i32_0 = arith.constant 0 : i32
    %c0_i32_1 = arith.constant 0 : i32
    return %c0_i32, %c0_i32_0 : i32, i32
  }
  func.func @transform_2(%arg0: i32) -> (i32, i32) {
    %c0_i32 = arith.constant 0 : i32
    %c0_i32_0 = arith.constant 0 : i32
    %c0_i32_1 = arith.constant 0 : i32
    return %c0_i32, %c0_i32_0 : i32, i32
  }
  func.func @transform_3(%arg0: i32) -> (i32, i32) {
    %c0_i32 = arith.constant 0 : i32
    %c0_i32_0 = arith.constant 0 : i32
    %c0_i32_1 = arith.constant 0 : i32
    return %c0_i32, %c0_i32_0 : i32, i32
  }
  func.func @transform_4(%arg0: i32) -> (i32, i32) {
    %c0_i32 = arith.constant 0 : i32
    %c0_i32_0 = arith.constant 0 : i32
    %c0_i32_1 = arith.constant 0 : i32
    return %c0_i32, %c0_i32_0 : i32, i32
  }
  func.func @transform_5(%arg0: i32) -> (i32, i32) {
    %c0_i32 = arith.constant 0 : i32
    %c0_i32_0 = arith.constant 0 : i32
    %c0_i32_1 = arith.constant 0 : i32
    return %c0_i32, %c0_i32_0 : i32, i32
  }
  func.func @transform_6(%arg0: i32) -> (i32, i32) {
    %c0_i32 = arith.constant 0 : i32
    %c0_i32_0 = arith.constant 0 : i32
    %c0_i32_1 = arith.constant 0 : i32
    return %c0_i32, %c0_i32_0 : i32, i32
  }
  func.func @transform_7(%arg0: i32) -> (i32, i32) {
    %c0_i32 = arith.constant 0 : i32
    %c0_i32_0 = arith.constant 0 : i32
    return %arg0, %c0_i32 : i32, i32
  }
}

</mosaic_0001>

<bundles_post_ra>
// kernel: neural_network_forward.1
= control target key start
LH: loop header
LB: loop body
LE: loop exit
PB: predicated region body
PF: predicated region fallthrough
CT: control target
= control target key end

     0   :  { %12 = vsyncpa [#allocation3], 0  ;;  %s4178_s0 = inlined_call_operand.vmem [shape: f32[8,784], index: 0, kind: input, shape index: {}]   ;;  %s4179_s1 = inlined_call_operand.hbm [shape: bf16[784,512], index: 1, kind: input, shape index: {}]   ;;  %s4180_s2 = inlined_call_operand.vmem [shape: f32[1,512], index: 2, kind: input, shape index: {}]   ;;  %s4181_s3 = inlined_call_operand.hbm [shape: bf16[512,512], index: 3, kind: input, shape index: {}]   ;;  %s4182_s4 = inlined_call_operand.vmem [shape: f32[1,512], index: 4, kind: input, shape index: {}]   ;;  %s4183_s5 = inlined_call_operand.vmem [shape: bf16[512,128], index: 5, kind: input, shape index: {}]   ;;  %s4184_s6 = inlined_call_operand.vmem [shape: f32[1,128], index: 6, kind: input, shape index: {}]   ;;  %s4185_s7 = inlined_call_operand.hbm [shape: f32[8,128], index: 7, kind: output, shape index: {}]  }
   0x1   :  { %13 = vsyncpa [#allocation6], 0 }
   0x2   :  { %14 = vsyncpa [#allocation4], 0  ;;  %s3923_s24 = smov [#allocation2]  }
   0x3   :  { %s22_s25 = sshll.u32 %s3923_s24, 4  ;;  %s23_s25 = int_to_ptr.vmem [resolvable:$true] %s22_s25 }
   0x4   :  { %s3865_s26 = scalar_lea.vmem %s23_s25, 25088  ;;  %p3870_p1 = scmp.lt.s32.totalorder %s23_s25, %s23_s25 }
   0x5   :  { %p3866_p0 = scmp.ne.s32.totalorder %s23_s25, %s3865_s26  ;;  %p3871_p2 = scmp.lt.s32.totalorder %s3865_s26, %s3865_s26 }
   0x7   :  { %p3872_p3 = por %p3871_p2, %p3870_p1 }
   0x9   :  { %p3873_p4 = pnand %p3872_p3, %p3866_p0 }
   0xb   :  { %3876 = shalt.err (!%p3873_p4)
}
   0xc   :  { %s3924_s27 = smov 256   ;;  %s3925_s28 = smov 16  }
   0xd   :  { %28 = dma.hbm_to_vmem [thread:$0]  %s4179_s1, 25088, %s23_s25, [#allocation3], %s3924_s27, %s3924_s27, %s3925_s28  }
   0xe   :  { %s3926_s8 = smov [#allocation5]  }
   0xf   :  { %s36_s9 = sshll.u32 %s3926_s8, 4  ;;  %s37_s9 = int_to_ptr.vmem [resolvable:$true] %s36_s9 }
  0x10   :  { %s3885_s10 = scalar_lea.vmem %s37_s9, 16384  ;;  %p3890_p6 = scmp.lt.s32.totalorder %s37_s9, %s37_s9 }
  0x11   :  { %p3886_p5 = scmp.ne.s32.totalorder %s37_s9, %s3885_s10  ;;  %p3891_p7 = scmp.lt.s32.totalorder %s3885_s10, %s3885_s10 }
  0x13   :  { %p3892_p8 = por %p3891_p7, %p3890_p6 }
  0x15   :  { %p3893_p9 = pnand %p3892_p8, %p3886_p5 }
  0x17   :  { %3896 = shalt.err (!%p3893_p9)
}
  0x18   :  { %42 = dma.hbm_to_vmem [thread:$0]  %s4181_s3, 16384, %s37_s9, [#allocation6], %s3924_s27, %s3924_s27, %s3925_s28  }
  0x19   :  { %3917 = dma.done.wait [#allocation3], 25088  }
  0x1a   :  { %3918 = vsyncadd [#allocation3], 4294942208 }
  0x1b   :  { %3919 = dma.done.wait [#allocation6], 16384  }
  0x1c   :  { %3920 = vsyncadd [#allocation6], 4294950912  ;;  %v3339_v0 = vld [vmem:[#allocation2 + $0xe4] ss:$16 sps:$4 sm:$0xff]   ;;  %v3343_v2 = vld [vmem:[#allocation2 + $0xe0] ss:$16 sps:$4 sm:$0xff]  }
  0x1d   :  { %v3341_v1 = vld [vmem:[#allocation2 + $0x2e4] ss:$16 sps:$4 sm:$0xff]   ;;  %1272 = vmatprep.subr.bf16.mxu0 %v3339_v0  ;;  %v3344_v3 = vld [vmem:[#allocation2 + $0x2e0] ss:$16 sps:$4 sm:$0xff]   ;;  %v57_v46 = vld [vmem:[%s4178_s0 + $0x8] sm:$0xff]  ;;  %vm1268_vm0 = vcmask 130048  }
  0x1e   :  { %1313 = vmatprep.subr.bf16.mxu1 %v3341_v1  ;;  %v3345_v4 = vld [vmem:[#allocation2 + $0xc4] ss:$16 sps:$4 sm:$0xff]   ;;  %1273 = vmatpush1.bf16.msra.mxu0 %v3343_v2  ;;  %v3349_v6 = vld [vmem:[#allocation2 + $0xc0] ss:$16 sps:$4 sm:$0xff]   ;;  %v3978_v49 = vpack.c.bf16 %v57_v46, %v57_v46  ;;  %v59_v50 = vld [vmem:[%s4178_s0 + $0x18] sm:$0xff]  ;;  %s3928_s3 = smov [#allocation7]  }
  0x1f   :  { %1314 = vmatpush1.bf16.msra.mxu1 %v3344_v3  ;;  %v3347_v5 = vld [vmem:[#allocation2 + $0x2c4] ss:$16 sps:$4 sm:$0xff]   ;;  %1274 = vmatprep.subr.bf16.mxu0 %v3345_v4  ;;  %v3350_v7 = vld [vmem:[#allocation2 + $0x2c0] ss:$16 sps:$4 sm:$0xff]   ;;  %v3983_v52 = vpack.c.bf16 %v59_v50, %v59_v50  ;;  %s2920_s13 = sshll.u32 %s3928_s3, 4  ;;  %s2921_s13 = int_to_ptr.vmem [resolvable:$true] %s2920_s13 }
  0x20   :  { %1315 = vmatprep.subr.bf16.mxu1 %v3347_v5  ;;  %v3351_v8 = vld [vmem:[#allocation2 + $0xa4] ss:$16 sps:$4 sm:$0xff]   ;;  %v3355_v10 = vld [vmem:[#allocation2 + $0xa0] ss:$16 sps:$4 sm:$0xff]   ;;  %1304 = vmatprep.mubr.bf16.mxu0 %v3978_v49  ;;  %s3897_s14 = scalar_lea.vmem %s2921_s13, 128  ;;  %p3902_p11 = scmp.lt.s32.totalorder %s2921_s13, %s2921_s13 }
  0x21   :  { %v3353_v9 = vld [vmem:[#allocation2 + $0x2a4] ss:$16 sps:$4 sm:$0xff]   ;;  %v3356_v11 = vld [vmem:[#allocation2 + $0x2a0] ss:$16 sps:$4 sm:$0xff]   ;;  %1345 = vmatprep.mubr.bf16.mxu1 %v3983_v52  ;;  %p3898_p10 = scmp.ne.s32.totalorder %s2921_s13, %s3897_s14  ;;  %p3903_p12 = scmp.lt.s32.totalorder %s3897_s14, %s3897_s14 }
  0x22   :  { %1275 = vmatpush1.bf16.msra.mxu0 %v3349_v6  ;;  %v3357_v12 = vld [vmem:[#allocation2 + $0x84] ss:$16 sps:$4 sm:$0xff]   ;;  %v3361_v14 = vld [vmem:[#allocation2 + $0x80] ss:$16 sps:$4 sm:$0xff]  }
  0x23   :  { %1316 = vmatpush1.bf16.msra.mxu1 %v3350_v7  ;;  %1276 = vmatprep.subr.bf16.mxu0 %v3351_v8  ;;  %v3359_v13 = vld [vmem:[#allocation2 + $0x284] ss:$16 sps:$4 sm:$0xff]   ;;  %v3362_v15 = vld [vmem:[#allocation2 + $0x280] ss:$16 sps:$4 sm:$0xff]   ;;  %p3904_p13 = por %p3903_p12, %p3902_p11 }
  0x24   :  { %1317 = vmatprep.subr.bf16.mxu1 %v3353_v9  ;;  %v3363_v16 = vld [vmem:[#allocation2 + $0x64] ss:$16 sps:$4 sm:$0xff]   ;;  %v3367_v18 = vld [vmem:[#allocation2 + $0x60] ss:$16 sps:$4 sm:$0xff]  }
  0x25   :  { %v3365_v17 = vld [vmem:[#allocation2 + $0x264] ss:$16 sps:$4 sm:$0xff]   ;;  %v3368_v19 = vld [vmem:[#allocation2 + $0x260] ss:$16 sps:$4 sm:$0xff]   ;;  %p3905_p0 = pnand %p3904_p13, %p3898_p10 }
  0x26   :  { %1277 = vmatpush1.bf16.msra.mxu0 %v3355_v10  ;;  %v3369_v20 = vld [vmem:[#allocation2 + $0x44] ss:$16 sps:$4 sm:$0xff]   ;;  %v3373_v22 = vld [vmem:[#allocation2 + $0x40] ss:$16 sps:$4 sm:$0xff]  }
  0x27   :  { %1318 = vmatpush1.bf16.msra.mxu1 %v3356_v11  ;;  %1278 = vmatprep.subr.bf16.mxu0 %v3357_v12  ;;  %v3371_v21 = vld [vmem:[#allocation2 + $0x244] ss:$16 sps:$4 sm:$0xff]   ;;  %v3374_v23 = vld [vmem:[#allocation2 + $0x240] ss:$16 sps:$4 sm:$0xff]  }
  0x28   :  { %1319 = vmatprep.subr.bf16.mxu1 %v3359_v13  ;;  %v3375_v24 = vld [vmem:[#allocation2 + $0x24] ss:$16 sps:$4 sm:$0xff]   ;;  %v3379_v26 = vld [vmem:[#allocation2 + $0x20] ss:$16 sps:$4 sm:$0xff]   ;;  %v3446_v13 = vld [vmem:[#allocation2 + $0xec] ss:$16 sps:$4 sm:$0xff]  }
  0x29   :  { %v3377_v25 = vld [vmem:[#allocation2 + $0x224] ss:$16 sps:$4 sm:$0xff]   ;;  %v3380_v27 = vld [vmem:[#allocation2 + $0x220] ss:$16 sps:$4 sm:$0xff]  }
  0x2a   :  { %1279 = vmatpush1.bf16.msra.mxu0 %v3361_v14  ;;  %v3381_v28 = vld [vmem:[#allocation2 + $0x4] ss:$16 sps:$4 sm:$0xff]   ;;  %v3385_v30 = vld [vmem:[#allocation2] ss:$16 sps:$4 sm:$0xff]  }
  0x2b   :  { %1320 = vmatpush1.bf16.msra.mxu1 %v3362_v15  ;;  %1280 = vmatprep.subr.bf16.mxu0 %v3363_v16  ;;  %v3383_v29 = vld [vmem:[#allocation2 + $0x204] ss:$16 sps:$4 sm:$0xff]   ;;  %v3386_v31 = vld [vmem:[#allocation2 + $0x200] ss:$16 sps:$4 sm:$0xff]   ;;  %v3927_v16 = vmov 0  }
  0x2c   :  { %1321 = vmatprep.subr.bf16.mxu1 %v3365_v17  ;;  %v3387_v32 = vld [vmem:[#allocation2 + $0x1e4] ss:$16 sps:$4 sm:$0xff]   ;;  %v3391_v34 = vld [vmem:[#allocation2 + $0x1e0] ss:$16 sps:$4 sm:$0xff]  }
  0x2d   :  { %v3389_v33 = vld [vmem:[#allocation2 + $0x3e4] ss:$16 sps:$4 sm:$0xff]   ;;  %v3392_v35 = vld [vmem:[#allocation2 + $0x3e0] ss:$16 sps:$4 sm:$0xff]  }
  0x2e   :  { %1281 = vmatpush1.bf16.msra.mxu0 %v3367_v18  ;;  %v3393_v36 = vld [vmem:[#allocation2 + $0x1c4] ss:$16 sps:$4 sm:$0xff]   ;;  %v3397_v38 = vld [vmem:[#allocation2 + $0x1c0] ss:$16 sps:$4 sm:$0xff]   ;;  %v3444_v18 = vld [vmem:[#allocation2 + $0xe8] ss:$16 sps:$4 sm:$0xff]  }
  0x2f   :  { %1322 = vmatpush1.bf16.msra.mxu1 %v3368_v19  ;;  %1282 = vmatprep.subr.bf16.mxu0 %v3369_v20  ;;  %v3395_v37 = vld [vmem:[#allocation2 + $0x3c4] ss:$16 sps:$4 sm:$0xff]   ;;  %v3398_v39 = vld [vmem:[#allocation2 + $0x3c0] ss:$16 sps:$4 sm:$0xff]  }
  0x30   :  { %1323 = vmatprep.subr.bf16.mxu1 %v3371_v21  ;;  %v3399_v40 = vld [vmem:[#allocation2 + $0x1a4] ss:$16 sps:$4 sm:$0xff]   ;;  %v3403_v42 = vld [vmem:[#allocation2 + $0x1a0] ss:$16 sps:$4 sm:$0xff]   ;;  %v3452_v21 = vld [vmem:[#allocation2 + $0xcc] ss:$16 sps:$4 sm:$0xff]  }
  0x31   :  { %v3401_v41 = vld [vmem:[#allocation2 + $0x3a4] ss:$16 sps:$4 sm:$0xff]   ;;  %v3404_v43 = vld [vmem:[#allocation2 + $0x3a0] ss:$16 sps:$4 sm:$0xff]  }
  0x32   :  { %1283 = vmatpush1.bf16.msra.mxu0 %v3373_v22  ;;  %v3405_v44 = vld [vmem:[#allocation2 + $0x184] ss:$16 sps:$4 sm:$0xff]   ;;  %v3409_v47 = vld [vmem:[#allocation2 + $0x180] ss:$16 sps:$4 sm:$0xff]  }
  0x33   :  { %1324 = vmatpush1.bf16.msra.mxu1 %v3374_v23  ;;  %1284 = vmatprep.subr.bf16.mxu0 %v3375_v24  ;;  %v3407_v45 = vld [vmem:[#allocation2 + $0x384] ss:$16 sps:$4 sm:$0xff]   ;;  %v3410_v48 = vld [vmem:[#allocation2 + $0x380] ss:$16 sps:$4 sm:$0xff]   ;;  %v3450_v23 = vld [vmem:[#allocation2 + $0xc8] ss:$16 sps:$4 sm:$0xff]  }
  0x34   :  { %1325 = vmatprep.subr.bf16.mxu1 %v3377_v25  ;;  %v3411_v51 = vld [vmem:[#allocation2 + $0x164] ss:$16 sps:$4 sm:$0xff]   ;;  %v3415_v54 = vld [vmem:[#allocation2 + $0x160] ss:$16 sps:$4 sm:$0xff]   ;;  %v3458_v25 = vld [vmem:[#allocation2 + $0xac] ss:$16 sps:$4 sm:$0xff]  }
  0x35   :  { %v3413_v53 = vld [vmem:[#allocation2 + $0x364] ss:$16 sps:$4 sm:$0xff]   ;;  %v3416_v55 = vld [vmem:[#allocation2 + $0x360] ss:$16 sps:$4 sm:$0xff]  }
  0x36   :  { %1285 = vmatpush1.bf16.msra.mxu0 %v3379_v26  ;;  %v3417_v56 = vld [vmem:[#allocation2 + $0x144] ss:$16 sps:$4 sm:$0xff]   ;;  %v3421_v58 = vld [vmem:[#allocation2 + $0x140] ss:$16 sps:$4 sm:$0xff]  }
  0x37   :  { %1326 = vmatpush1.bf16.msra.mxu1 %v3380_v27  ;;  %1286 = vmatprep.subr.bf16.mxu0 %v3381_v28  ;;  %v3419_v57 = vld [vmem:[#allocation2 + $0x344] ss:$16 sps:$4 sm:$0xff]   ;;  %v3422_v59 = vld [vmem:[#allocation2 + $0x340] ss:$16 sps:$4 sm:$0xff]   ;;  %v3456_v27 = vld [vmem:[#allocation2 + $0xa8] ss:$16 sps:$4 sm:$0xff]  }
  0x38   :  { %1327 = vmatprep.subr.bf16.mxu1 %v3383_v29  ;;  %v3423_v60 = vld [vmem:[#allocation2 + $0x124] ss:$16 sps:$4 sm:$0xff]   ;;  %v3427_v62 = vld [vmem:[#allocation2 + $0x120] ss:$16 sps:$4 sm:$0xff]   ;;  %v3464_v29 = vld [vmem:[#allocation2 + $0x8c] ss:$16 sps:$4 sm:$0xff]  }
  0x39   :  { %v3425_v61 = vld [vmem:[#allocation2 + $0x324] ss:$16 sps:$4 sm:$0xff]   ;;  %v3428_v63 = vld [vmem:[#allocation2 + $0x320] ss:$16 sps:$4 sm:$0xff]  }
  0x3a   :  { %1287 = vmatpush1.bf16.msra.mxu0 %v3385_v30  ;;  %v3429_v0 = vld [vmem:[#allocation2 + $0x104] ss:$16 sps:$4 sm:$0xff]   ;;  %v3433_v2 = vld [vmem:[#allocation2 + $0x100] ss:$16 sps:$4 sm:$0xff]  }
  0x3b   :  { %1328 = vmatpush1.bf16.msra.mxu1 %v3386_v31  ;;  %1288 = vmatprep.subr.bf16.mxu0 %v3387_v32  ;;  %v3431_v1 = vld [vmem:[#allocation2 + $0x304] ss:$16 sps:$4 sm:$0xff]   ;;  %v3434_v3 = vld [vmem:[#allocation2 + $0x300] ss:$16 sps:$4 sm:$0xff]   ;;  %v3462_v31 = vld [vmem:[#allocation2 + $0x88] ss:$16 sps:$4 sm:$0xff]  }
  0x3c   :  { %1329 = vmatprep.subr.bf16.mxu1 %v3389_v33  ;;  %v56_v4 = vld [vmem:[%s4178_s0] sm:$0xff]  ;;  %v58_v5 = vld [vmem:[%s4178_s0 + $0x10] sm:$0xff]  ;;  %v3470_v33 = vld [vmem:[#allocation2 + $0x6c] ss:$16 sps:$4 sm:$0xff]  }
  0x3d   :  { %v3437_v6 = vld [vmem:[#allocation2 + $0x4e4] ss:$16 sps:$4 sm:$0xff]   ;;  %v3993_v8 = vpack.c.bf16 %v56_v4, %v56_v4  ;;  %v3995_v9 = vpack.c.bf16 %v58_v5, %v58_v5  ;;  %v3435_v10 = vld [vmem:[#allocation2 + $0x4e0] ss:$16 sps:$4 sm:$0xff]   ;;  %v3518_v4 = vld [vmem:[#allocation2 + $0x16c] ss:$16 sps:$4 sm:$0xff]  }
  0x3e   :  { %1289 = vmatpush2.bf16.msra.mxu0 %v3391_v34  ;;  %v3440_v7 = vld [vmem:[#allocation2 + $0x604] ss:$16 sps:$4 sm:$0xff]   ;;  %v3438_v11 = vld [vmem:[#allocation2 + $0x600] ss:$16 sps:$4 sm:$0xff]  }
  0x3f   :  { %1330 = vmatpush2.bf16.msra.mxu1 %v3392_v35  ;;  %1290 = vmatprep.subr.bf16.mxu0 %v3393_v36  ;;  %v3443_v12 = vld [vmem:[#allocation2 + $0x4c4] ss:$16 sps:$4 sm:$0xff]   ;;  %v3441_v14 = vld [vmem:[#allocation2 + $0x4c0] ss:$16 sps:$4 sm:$0xff]   ;;  %v61_v35 = vld [vmem:[%s4178_s0 + $0x28] sm:$0xff] }
  0x40   :  { %1331 = vmatprep.subr.bf16.mxu1 %v3395_v37  ;;  %v62_v15 = vld [vmem:[%s4178_s0 + $0x30] sm:$0xff]  ;;  %v4011_v36 = vpack.c.bf16 %v61_v35, %v61_v35  ;;  %v3468_v37 = vld [vmem:[#allocation2 + $0x68] ss:$16 sps:$4 sm:$0xff]   ;;  %v3557_v35 = vld [vmem:[#allocation2 + $0x26c] ss:$16 sps:$4 sm:$0xff]  }
  0x41   :  { %v3449_v17 = vld [vmem:[#allocation2 + $0x4a4] ss:$16 sps:$4 sm:$0xff]   ;;  %v4003_v19 = vpack.c.bf16 %v62_v15, %v62_v15  ;;  %v3447_v20 = vld [vmem:[#allocation2 + $0x4a0] ss:$16 sps:$4 sm:$0xff]  }
  0x42   :  { %1291 = vmatpush2.bf16.msra.mxu0 %v3397_v38  ;;  %v3455_v22 = vld [vmem:[#allocation2 + $0x484] ss:$16 sps:$4 sm:$0xff]   ;;  %v3453_v24 = vld [vmem:[#allocation2 + $0x480] ss:$16 sps:$4 sm:$0xff]  }
  0x43   :  { %1332 = vmatpush2.bf16.msra.mxu1 %v3398_v39  ;;  %1292 = vmatprep.subr.bf16.mxu0 %v3399_v40  ;;  %v3461_v26 = vld [vmem:[#allocation2 + $0x464] ss:$16 sps:$4 sm:$0xff]   ;;  %v3459_v28 = vld [vmem:[#allocation2 + $0x460] ss:$16 sps:$4 sm:$0xff]   ;;  %v3476_v39 = vld [vmem:[#allocation2 + $0x4c] ss:$16 sps:$4 sm:$0xff]  }
  0x44   :  { %1333 = vmatprep.subr.bf16.mxu1 %v3401_v41  ;;  %v3467_v30 = vld [vmem:[#allocation2 + $0x444] ss:$16 sps:$4 sm:$0xff]   ;;  %v3465_v32 = vld [vmem:[#allocation2 + $0x440] ss:$16 sps:$4 sm:$0xff]   ;;  %v3474_v41 = vld [vmem:[#allocation2 + $0x48] ss:$16 sps:$4 sm:$0xff]  }
  0x45   :  { %v3473_v34 = vld [vmem:[#allocation2 + $0x424] ss:$16 sps:$4 sm:$0xff]   ;;  %v3471_v38 = vld [vmem:[#allocation2 + $0x420] ss:$16 sps:$4 sm:$0xff]  }
  0x46   :  { %1293 = vmatpush2.bf16.msra.mxu0 %v3403_v42  ;;  %v3479_v40 = vld [vmem:[#allocation2 + $0x404] ss:$16 sps:$4 sm:$0xff]   ;;  %v3477_v42 = vld [vmem:[#allocation2 + $0x400] ss:$16 sps:$4 sm:$0xff]  }
  0x47   :  { %1334 = vmatpush2.bf16.msra.mxu1 %v3404_v43  ;;  %1294 = vmatprep.subr.bf16.mxu0 %v3405_v44  ;;  %v3482_v43 = vld [vmem:[#allocation2 + $0x2c] ss:$16 sps:$4 sm:$0xff]   ;;  %v3485_v44 = vld [vmem:[#allocation2 + $0x5e4] ss:$16 sps:$4 sm:$0xff]   ;;  %v3483_v46 = vld [vmem:[#allocation2 + $0x5e0] ss:$16 sps:$4 sm:$0xff]  }
  0x48   :  { %1335 = vmatprep.subr.bf16.mxu1 %v3407_v45  ;;  %v3480_v45 = vld [vmem:[#allocation2 + $0x28] ss:$16 sps:$4 sm:$0xff]   ;;  %v3489_v50 = vld [vmem:[#allocation2 + $0x5c0] ss:$16 sps:$4 sm:$0xff]   ;;  %v3521_v5 = vld [vmem:[#allocation2 + $0x524] ss:$16 sps:$4 sm:$0xff]  }
  0x49   :  { %v60_v15 = vld [vmem:[%s4178_s0 + $0x20] sm:$0xff] }
  0x4a   :  { %1295 = vmatpush2.bf16.msra.mxu0 %v3409_v47  ;;  %v3488_v47 = vld [vmem:[#allocation2 + $0xc] ss:$16 sps:$4 sm:$0xff]  }
  0x4b   :  { %1336 = vmatpush2.bf16.msra.mxu1 %v3410_v48  ;;  %1296 = vmatprep.subr.bf16.mxu0 %v3411_v51  ;;  %v3491_v48 = vld [vmem:[#allocation2 + $0x5c4] ss:$16 sps:$4 sm:$0xff]   ;;  %v3494_v51 = vld [vmem:[#allocation2 + $0x1ec] ss:$16 sps:$4 sm:$0xff]  }
  0x4c   :  { %1337 = vmatprep.subr.bf16.mxu1 %v3413_v53  ;;  %v3497_v53 = vld [vmem:[#allocation2 + $0x5a4] ss:$16 sps:$4 sm:$0xff]  }
  0x4e   :  { %1297 = vmatpush2.bf16.msra.mxu0 %v3415_v54  ;;  %v3492_v54 = vld [vmem:[#allocation2 + $0x1e8] ss:$16 sps:$4 sm:$0xff]  }
  0x4f   :  { %1338 = vmatpush2.bf16.msra.mxu1 %v3416_v55  ;;  %1298 = vmatprep.subr.bf16.mxu0 %v3417_v56  ;;  %v3495_v55 = vld [vmem:[#allocation2 + $0x5a0] ss:$16 sps:$4 sm:$0xff]   ;;  %v3500_v56 = vld [vmem:[#allocation2 + $0x1cc] ss:$16 sps:$4 sm:$0xff]  }
  0x50   :  { %1339 = vmatprep.subr.bf16.mxu1 %v3419_v57  ;;  %v3503_v57 = vld [vmem:[#allocation2 + $0x584] ss:$16 sps:$4 sm:$0xff]  }
  0x52   :  { %1299 = vmatpush2.bf16.msra.mxu0 %v3421_v58  ;;  %v3498_v58 = vld [vmem:[#allocation2 + $0x1c8] ss:$16 sps:$4 sm:$0xff]  }
  0x53   :  { %1340 = vmatpush2.bf16.msra.mxu1 %v3422_v59  ;;  %1300 = vmatprep.subr.bf16.mxu0 %v3423_v60  ;;  %v3501_v59 = vld [vmem:[#allocation2 + $0x580] ss:$16 sps:$4 sm:$0xff]   ;;  %v3506_v60 = vld [vmem:[#allocation2 + $0x1ac] ss:$16 sps:$4 sm:$0xff]  }
  0x54   :  { %1341 = vmatprep.subr.bf16.mxu1 %v3425_v61  ;;  %v3509_v61 = vld [vmem:[#allocation2 + $0x564] ss:$16 sps:$4 sm:$0xff]  }
  0x56   :  { %1301 = vmatpush2.bf16.msra.mxu0 %v3427_v62  ;;  %v3504_v62 = vld [vmem:[#allocation2 + $0x1a8] ss:$16 sps:$4 sm:$0xff]  }
  0x57   :  { %1342 = vmatpush2.bf16.msra.mxu1 %v3428_v63  ;;  %1302 = vmatprep.subr.bf16.mxu0 %v3429_v0  ;;  %v3507_v63 = vld [vmem:[#allocation2 + $0x560] ss:$16 sps:$4 sm:$0xff]   ;;  %v3512_v0 = vld [vmem:[#allocation2 + $0x18c] ss:$16 sps:$4 sm:$0xff]  }
  0x58   :  { %1343 = vmatprep.subr.bf16.mxu1 %v3431_v1  ;;  %v3515_v1 = vld [vmem:[#allocation2 + $0x544] ss:$16 sps:$4 sm:$0xff]  }
  0x5a   :  { %1303 = vmatpush2.bf16.msra.mxu0 %v3433_v2  ;;  %v3510_v2 = vld [vmem:[#allocation2 + $0x188] ss:$16 sps:$4 sm:$0xff]  }
  0x5b   :  { %1344 = vmatpush2.bf16.msra.mxu1 %v3434_v3  ;;  %1354 = vmatprep.subr.bf16.mxu0 %v3437_v6  ;;  %v3513_v3 = vld [vmem:[#allocation2 + $0x540] ss:$16 sps:$4 sm:$0xff]   ;;  %v3516_v6 = vld [vmem:[#allocation2 + $0x168] ss:$16 sps:$4 sm:$0xff]  }
  0x5c   :  { %1409 = vmatprep.subr.bf16.mxu1 %v3440_v7  ;;  %v3519_v7 = vld [vmem:[#allocation2 + $0x520] ss:$16 sps:$4 sm:$0xff]  }
  0x5d   :  { %1305 = vmatmul.mubr.bf16.vlgmr.msra.gmra.mxu0 %v3993_v8 }
  0x5e   :  { %1346 = vmatmul.mubr.bf16.vlgmr.msra.gmra.mxu1 %v3995_v9  ;;  %1355 = vmatpush1.bf16.msra.mxu0 %v3435_v10  ;;  %v3524_v10 = vld [vmem:[#allocation2 + $0x14c] ss:$16 sps:$4 sm:$0xff]  }
  0x5f   :  { %1410 = vmatpush1.bf16.msra.mxu1 %v3438_v11  ;;  %1356 = vmatprep.subr.bf16.mxu0 %v3443_v12  ;;  %v3527_v11 = vld [vmem:[#allocation2 + $0x504] ss:$16 sps:$4 sm:$0xff]   ;;  %v3522_v12 = vld [vmem:[#allocation2 + $0x148] ss:$16 sps:$4 sm:$0xff]  }
  0x60   :  { %1427 = vmatprep.mubr.bf16.mxu1 %v3927_v16  ;;  %1436 = vmatprep.subr.bf16.mxu1 %v3446_v13  ;;  %v3525_v13 = vld [vmem:[#allocation2 + $0x500] ss:$16 sps:$4 sm:$0xff]  }
  0x61   :  { %1386 = vmatprep.mubr.bf16.mxu0 %v4011_v36 }
  0x62   :  { %1357 = vmatpush1.bf16.msra.mxu0 %v3441_v14  ;;  %v3530_v14 = vld [vmem:[#allocation2 + $0x12c] ss:$16 sps:$4 sm:$0xff]  }
  0x63   :  { %1358 = vmatprep.subr.bf16.mxu0 %v3449_v17  ;;  %v3533_v17 = vld [vmem:[#allocation2 + $0x2ec] ss:$16 sps:$4 sm:$0xff]  }
  0x66   :  { %3126 = vmatmul.mubr.msk.bf16.vlgmr.msra.gmra.mxu1 %vm1268_vm0, %v4003_v19  ;;  %1359 = vmatpush1.bf16.msra.mxu0 %v3447_v20  ;;  %v4017_v20 = vpack.c.bf16 %v60_v15, %v60_v15  ;;  %v3620_v15 = vld [vmem:[#allocation2 + $0x54c] ss:$16 sps:$4 sm:$0xff]  }
  0x67   :  { %1437 = vmatpush1.bf16.msra.mxu1 %v3444_v18  ;;  %1360 = vmatprep.subr.bf16.mxu0 %v3455_v22  ;;  %v3528_v18 = vld [vmem:[#allocation2 + $0x128] ss:$16 sps:$4 sm:$0xff]   ;;  %v3536_v22 = vld [vmem:[#allocation2 + $0x10c] ss:$16 sps:$4 sm:$0xff]  }
  0x68   :  { %1438 = vmatprep.subr.bf16.mxu1 %v3452_v21  ;;  %1468 = vmatprep.mubr.bf16.mxu1 %v3978_v49  ;;  %v3486_v49 = vld [vmem:[#allocation2 + $0x8] ss:$16 sps:$4 sm:$0xff]  }
  0x69   :  { %v3531_v21 = vld [vmem:[#allocation2 + $0x2e8] ss:$16 sps:$4 sm:$0xff]  }
  0x6a   :  { %1361 = vmatpush1.bf16.msra.mxu0 %v3453_v24  ;;  %v3534_v24 = vld [vmem:[#allocation2 + $0x108] ss:$16 sps:$4 sm:$0xff]  }
  0x6b   :  { %1439 = vmatpush1.bf16.msra.mxu1 %v3450_v23  ;;  %1362 = vmatprep.subr.bf16.mxu0 %v3461_v26  ;;  %v3539_v23 = vld [vmem:[#allocation2 + $0x2cc] ss:$16 sps:$4 sm:$0xff]  }
  0x6c   :  { %1440 = vmatprep.subr.bf16.mxu1 %v3458_v25  ;;  %v3537_v25 = vld [vmem:[#allocation2 + $0x2c8] ss:$16 sps:$4 sm:$0xff]   ;;  %v3542_v26 = vld [vmem:[#allocation2 + $0x4ec] ss:$16 sps:$4 sm:$0xff]  }
  0x6e   :  { %1363 = vmatpush1.bf16.msra.mxu0 %v3459_v28  ;;  %v3540_v28 = vld [vmem:[#allocation2 + $0x4e8] ss:$16 sps:$4 sm:$0xff]  }
  0x6f   :  { %1441 = vmatpush1.bf16.msra.mxu1 %v3456_v27  ;;  %1364 = vmatprep.subr.bf16.mxu0 %v3467_v30  ;;  %v3545_v27 = vld [vmem:[#allocation2 + $0x2ac] ss:$16 sps:$4 sm:$0xff]  }
  0x70   :  { %1442 = vmatprep.subr.bf16.mxu1 %v3464_v29  ;;  %v3543_v29 = vld [vmem:[#allocation2 + $0x2a8] ss:$16 sps:$4 sm:$0xff]   ;;  %v3548_v30 = vld [vmem:[#allocation2 + $0x4cc] ss:$16 sps:$4 sm:$0xff]  }
  0x72   :  { %1365 = vmatpush1.bf16.msra.mxu0 %v3465_v32  ;;  %v3546_v32 = vld [vmem:[#allocation2 + $0x4c8] ss:$16 sps:$4 sm:$0xff]  }
  0x73   :  { %1443 = vmatpush1.bf16.msra.mxu1 %v3462_v31  ;;  %1366 = vmatprep.subr.bf16.mxu0 %v3473_v34  ;;  %v3551_v31 = vld [vmem:[#allocation2 + $0x28c] ss:$16 sps:$4 sm:$0xff]  }
  0x74   :  { %1444 = vmatprep.subr.bf16.mxu1 %v3470_v33  ;;  %v3549_v33 = vld [vmem:[#allocation2 + $0x288] ss:$16 sps:$4 sm:$0xff]   ;;  %v3554_v34 = vld [vmem:[#allocation2 + $0x4ac] ss:$16 sps:$4 sm:$0xff]  }
  0x76   :  { %1367 = vmatpush1.bf16.msra.mxu0 %v3471_v38  ;;  %v3555_v38 = vld [vmem:[#allocation2 + $0x268] ss:$16 sps:$4 sm:$0xff]  }
  0x77   :  { %1445 = vmatpush1.bf16.msra.mxu1 %v3468_v37  ;;  %1368 = vmatprep.subr.bf16.mxu0 %v3479_v40  ;;  %v3552_v37 = vld [vmem:[#allocation2 + $0x4a8] ss:$16 sps:$4 sm:$0xff]  }
  0x78   :  { %1446 = vmatprep.subr.bf16.mxu1 %v3476_v39  ;;  %v3563_v39 = vld [vmem:[#allocation2 + $0x24c] ss:$16 sps:$4 sm:$0xff]   ;;  %v3558_v40 = vld [vmem:[#allocation2 + $0x488] ss:$16 sps:$4 sm:$0xff]  }
  0x7a   :  { %1369 = vmatpush1.bf16.msra.mxu0 %v3477_v42  ;;  %v3569_v42 = vld [vmem:[#allocation2 + $0x22c] ss:$16 sps:$4 sm:$0xff]  }
  0x7b   :  { %1447 = vmatpush1.bf16.msra.mxu1 %v3474_v41  ;;  %1370 = vmatprep.subr.bf16.mxu0 %v3485_v44  ;;  %v3566_v41 = vld [vmem:[#allocation2 + $0x46c] ss:$16 sps:$4 sm:$0xff]   ;;  %v3567_v44 = vld [vmem:[#allocation2 + $0x228] ss:$16 sps:$4 sm:$0xff]  }
  0x7c   :  { %1448 = vmatprep.subr.bf16.mxu1 %v3482_v43  ;;  %v3564_v43 = vld [vmem:[#allocation2 + $0x468] ss:$16 sps:$4 sm:$0xff]  }
  0x7e   :  { %1371 = vmatpush2.bf16.msra.mxu0 %v3483_v46  ;;  %v3570_v46 = vld [vmem:[#allocation2 + $0x448] ss:$16 sps:$4 sm:$0xff]  }
  0x7f   :  { %1449 = vmatpush1.bf16.msra.mxu1 %v3480_v45  ;;  %1372 = vmatprep.subr.bf16.mxu0 %v3491_v48  ;;  %v3575_v45 = vld [vmem:[#allocation2 + $0x20c] ss:$16 sps:$4 sm:$0xff]  }
  0x80   :  { %1450 = vmatprep.subr.bf16.mxu1 %v3488_v47  ;;  %v3573_v47 = vld [vmem:[#allocation2 + $0x208] ss:$16 sps:$4 sm:$0xff]   ;;  %v3578_v48 = vld [vmem:[#allocation2 + $0x42c] ss:$16 sps:$4 sm:$0xff]  }
  0x82   :  { %1373 = vmatpush2.bf16.msra.mxu0 %v3489_v50  ;;  %v3576_v50 = vld [vmem:[#allocation2 + $0x428] ss:$16 sps:$4 sm:$0xff]  }
  0x83   :  { %1451 = vmatpush1.bf16.msra.mxu1 %v3486_v49  ;;  %1374 = vmatprep.subr.bf16.mxu0 %v3497_v53  ;;  %v3581_v49 = vld [vmem:[#allocation2 + $0x3ec] ss:$16 sps:$4 sm:$0xff]  }
  0x84   :  { %1452 = vmatprep.subr.bf16.mxu1 %v3494_v51  ;;  %v3579_v51 = vld [vmem:[#allocation2 + $0x3e8] ss:$16 sps:$4 sm:$0xff]   ;;  %v3584_v53 = vld [vmem:[#allocation2 + $0x40c] ss:$16 sps:$4 sm:$0xff]  }
  0x86   :  { %1375 = vmatpush2.bf16.msra.mxu0 %v3495_v55  ;;  %v3582_v55 = vld [vmem:[#allocation2 + $0x408] ss:$16 sps:$4 sm:$0xff]  }
  0x87   :  { %1453 = vmatpush2.bf16.msra.mxu1 %v3492_v54  ;;  %1376 = vmatprep.subr.bf16.mxu0 %v3503_v57  ;;  %v3587_v54 = vld [vmem:[#allocation2 + $0x3cc] ss:$16 sps:$4 sm:$0xff]  }
  0x88   :  { %1454 = vmatprep.subr.bf16.mxu1 %v3500_v56  ;;  %v3585_v56 = vld [vmem:[#allocation2 + $0x3c8] ss:$16 sps:$4 sm:$0xff]   ;;  %v3590_v57 = vld [vmem:[#allocation2 + $0x5ec] ss:$16 sps:$4 sm:$0xff]  }
  0x8a   :  { %1377 = vmatpush2.bf16.msra.mxu0 %v3501_v59  ;;  %v3588_v59 = vld [vmem:[#allocation2 + $0x5e8] ss:$16 sps:$4 sm:$0xff]  }
  0x8b   :  { %1455 = vmatpush2.bf16.msra.mxu1 %v3498_v58  ;;  %1378 = vmatprep.subr.bf16.mxu0 %v3509_v61  ;;  %v3593_v58 = vld [vmem:[#allocation2 + $0x3ac] ss:$16 sps:$4 sm:$0xff]  }
  0x8c   :  { %1456 = vmatprep.subr.bf16.mxu1 %v3506_v60  ;;  %v3591_v60 = vld [vmem:[#allocation2 + $0x3a8] ss:$16 sps:$4 sm:$0xff]   ;;  %v3596_v61 = vld [vmem:[#allocation2 + $0x5cc] ss:$16 sps:$4 sm:$0xff]  }
  0x8e   :  { %1379 = vmatpush2.bf16.msra.mxu0 %v3507_v63  ;;  %v3594_v63 = vld [vmem:[#allocation2 + $0x5c8] ss:$16 sps:$4 sm:$0xff]  }
  0x8f   :  { %1457 = vmatpush2.bf16.msra.mxu1 %v3504_v62  ;;  %1380 = vmatprep.subr.bf16.mxu0 %v3515_v1  ;;  %v3599_v62 = vld [vmem:[#allocation2 + $0x38c] ss:$16 sps:$4 sm:$0xff]  }
  0x90   :  { %1458 = vmatprep.subr.bf16.mxu1 %v3512_v0  ;;  %v3597_v0 = vld [vmem:[#allocation2 + $0x388] ss:$16 sps:$4 sm:$0xff]   ;;  %v3602_v1 = vld [vmem:[#allocation2 + $0x5ac] ss:$16 sps:$4 sm:$0xff]  }
  0x92   :  { %1381 = vmatpush2.bf16.msra.mxu0 %v3513_v3  ;;  %v3600_v3 = vld [vmem:[#allocation2 + $0x5a8] ss:$16 sps:$4 sm:$0xff]  }
  0x93   :  { %1459 = vmatpush2.bf16.msra.mxu1 %v3510_v2  ;;  %1382 = vmatprep.subr.bf16.mxu0 %v3521_v5  ;;  %v3605_v2 = vld [vmem:[#allocation2 + $0x36c] ss:$16 sps:$4 sm:$0xff]  }
  0x94   :  { %1460 = vmatprep.subr.bf16.mxu1 %v3518_v4  ;;  %v3603_v4 = vld [vmem:[#allocation2 + $0x368] ss:$16 sps:$4 sm:$0xff]   ;;  %v3608_v5 = vld [vmem:[#allocation2 + $0x58c] ss:$16 sps:$4 sm:$0xff]  }
  0x96   :  { %1383 = vmatpush2.bf16.msra.mxu0 %v3519_v7  ;;  %v3606_v7 = vld [vmem:[#allocation2 + $0x588] ss:$16 sps:$4 sm:$0xff]  }
  0x97   :  { %1461 = vmatpush2.bf16.msra.mxu1 %v3516_v6  ;;  %1384 = vmatprep.subr.bf16.mxu0 %v3527_v11  ;;  %v3611_v6 = vld [vmem:[#allocation2 + $0x34c] ss:$16 sps:$4 sm:$0xff]  }
  0x98   :  { %1462 = vmatprep.subr.bf16.mxu1 %v3524_v10  ;;  %v3609_v10 = vld [vmem:[#allocation2 + $0x348] ss:$16 sps:$4 sm:$0xff]   ;;  %v3614_v11 = vld [vmem:[#allocation2 + $0x56c] ss:$16 sps:$4 sm:$0xff]  }
  0x9a   :  { %1385 = vmatpush2.bf16.msra.mxu0 %v3525_v13  ;;  %v3612_v13 = vld [vmem:[#allocation2 + $0x568] ss:$16 sps:$4 sm:$0xff]  }
  0x9b   :  { %1463 = vmatpush2.bf16.msra.mxu1 %v3522_v12  ;;  %1477 = vmatprep.subr.bf16.mxu0 %v3533_v17  ;;  %v3617_v12 = vld [vmem:[#allocation2 + $0x32c] ss:$16 sps:$4 sm:$0xff]  }
  0x9c   :  { %1464 = vmatprep.subr.bf16.mxu1 %v3530_v14  ;;  %v3615_v14 = vld [vmem:[#allocation2 + $0x328] ss:$16 sps:$4 sm:$0xff]   ;;  %v3623_v17 = vld [vmem:[#allocation2 + $0x30c] ss:$16 sps:$4 sm:$0xff]  }
  0x9d   :  { %1387 = vmatmul.mubr.bf16.vlgmr.msra.gmra.mxu0 %v4017_v20 }
  0x9e   :  { %1478 = vmatpush1.bf16.msra.mxu0 %v3531_v21  ;;  %1509 = vmatprep.mubr.bf16.mxu0 %v3983_v52  ;;  %v3560_v52 = vld [vmem:[#allocation2 + $0x48c] ss:$16 sps:$4 sm:$0xff]   ;;  %v3621_v21 = vld [vmem:[#allocation2 + $0x308] ss:$16 sps:$4 sm:$0xff]  }
  0x9f   :  { %1465 = vmatpush2.bf16.msra.mxu1 %v3528_v18  ;;  %1479 = vmatprep.subr.bf16.mxu0 %v3539_v23  ;;  %v3618_v18 = vld [vmem:[#allocation2 + $0x548] ss:$16 sps:$4 sm:$0xff]   ;;  %v3629_v23 = vld [vmem:[#allocation2 + $0x60c] ss:$16 sps:$4 sm:$0xff]  }
  0xa0   :  { %1466 = vmatprep.subr.bf16.mxu1 %v3536_v22  ;;  %v3626_v22 = vld [vmem:[#allocation2 + $0x52c] ss:$16 sps:$4 sm:$0xff]  }
  0xa2   :  { %1480 = vmatpush1.bf16.msra.mxu0 %v3537_v25  ;;  %v3627_v25 = vld [vmem:[#allocation2 + $0x608] ss:$16 sps:$4 sm:$0xff]  }
  0xa3   :  { %1467 = vmatpush2.bf16.msra.mxu1 %v3534_v24  ;;  %1481 = vmatprep.subr.bf16.mxu0 %v3545_v27  ;;  %v3624_v24 = vld [vmem:[#allocation2 + $0x528] ss:$16 sps:$4 sm:$0xff]   ;;  %v3635_v27 = vld [vmem:[#allocation5 + $0xe4] ss:$16 sps:$4 sm:$0xff]  }
  0xa4   :  { %1518 = vmatprep.subr.bf16.mxu1 %v3542_v26  ;;  %v3632_v26 = vld [vmem:[#allocation2 + $0x50c] ss:$16 sps:$4 sm:$0xff]  }
  0xa6   :  { %1469 = vmatmul.mubr.bf16.vlgmr.msra.gmra.mxu1 %v3993_v8  ;;  %1482 = vmatpush1.bf16.msra.mxu0 %v3543_v29  ;;  %v3561_v8 = vld [vmem:[#allocation2 + $0x248] ss:$16 sps:$4 sm:$0xff]   ;;  %v3633_v29 = vld [vmem:[#allocation5 + $0xe0] ss:$16 sps:$4 sm:$0xff]  }
  0xa7   :  { %1519 = vmatpush1.bf16.msra.mxu1 %v3540_v28  ;;  %1483 = vmatprep.subr.bf16.mxu0 %v3551_v31  ;;  %v3630_v28 = vld [vmem:[#allocation2 + $0x508] ss:$16 sps:$4 sm:$0xff]   ;;  %v3636_v31 = vld [vmem:[#allocation5 + $0xc0] ss:$16 sps:$4 sm:$0xff]  }
  0xa8   :  { %1520 = vmatprep.subr.bf16.mxu1 %v3548_v30  ;;  %1550 = vmatprep.mubr.bf16.mxu1 %v4011_v36  ;;  %v3572_v36 = vld [vmem:[#allocation2 + $0x44c] ss:$16 sps:$4 sm:$0xff]   ;;  %v3638_v30 = vld [vmem:[#allocation5 + $0xc4] ss:$16 sps:$4 sm:$0xff]  }
  0xaa   :  { %1484 = vmatpush1.bf16.msra.mxu0 %v3549_v33  ;;  %v3639_v33 = vld [vmem:[#allocation5 + $0xa0] ss:$16 sps:$4 sm:$0xff]  }
  0xab   :  { %1521 = vmatpush1.bf16.msra.mxu1 %v3546_v32  ;;  %1485 = vmatprep.subr.bf16.mxu0 %v3557_v35  ;;  %v3641_v32 = vld [vmem:[#allocation5 + $0xa4] ss:$16 sps:$4 sm:$0xff]  }
  0xac   :  { %1522 = vmatprep.subr.bf16.mxu1 %v3554_v34  ;;  %v3642_v34 = vld [vmem:[#allocation5 + $0x80] ss:$16 sps:$4 sm:$0xff]   ;;  %v3689_v35 = vld [vmem:[#allocation5 + $0x2e4] ss:$16 sps:$4 sm:$0xff]  }
  0xae   :  { %1486 = vmatpush1.bf16.msra.mxu0 %v3555_v38  ;;  %v3693_v38 = vld [vmem:[#allocation5 + $0x2c0] ss:$16 sps:$4 sm:$0xff]  }
  0xaf   :  { %1523 = vmatpush1.bf16.msra.mxu1 %v3552_v37  ;;  %1487 = vmatprep.subr.bf16.mxu0 %v3563_v39  ;;  %v3647_v37 = vld [vmem:[#allocation5 + $0x64] ss:$16 sps:$4 sm:$0xff]   ;;  %v3648_v39 = vld [vmem:[#allocation5 + $0x40] ss:$16 sps:$4 sm:$0xff]  }
  0xb0   :  { %1524 = vmatprep.subr.bf16.mxu1 %v3560_v52  ;;  %v3695_v52 = vld [vmem:[#allocation5 + $0x2c4] ss:$16 sps:$4 sm:$0xff]  }
  0xb2   :  { %1488 = vmatpush1.bf16.msra.mxu0 %v3561_v8  ;;  %v3701_v8 = vld [vmem:[#allocation5 + $0x2a4] ss:$16 sps:$4 sm:$0xff]  }
  0xb3   :  { %1525 = vmatpush1.bf16.msra.mxu1 %v3558_v40  ;;  %1489 = vmatprep.subr.bf16.mxu0 %v3569_v42  ;;  %v3699_v40 = vld [vmem:[#allocation5 + $0x2a0] ss:$16 sps:$4 sm:$0xff]  }
  0xb4   :  { %1526 = vmatprep.subr.bf16.mxu1 %v3566_v41  ;;  %v3653_v41 = vld [vmem:[#allocation5 + $0x24] ss:$16 sps:$4 sm:$0xff]   ;;  %v3651_v42 = vld [vmem:[#allocation5 + $0x20] ss:$16 sps:$4 sm:$0xff]  }
  0xb6   :  { %1490 = vmatpush1.bf16.msra.mxu0 %v3567_v44  ;;  %v3707_v44 = vld [vmem:[#allocation5 + $0x284] ss:$16 sps:$4 sm:$0xff]  }
  0xb7   :  { %1527 = vmatpush1.bf16.msra.mxu1 %v3564_v43  ;;  %1491 = vmatprep.subr.bf16.mxu0 %v3575_v45  ;;  %v3705_v43 = vld [vmem:[#allocation5 + $0x280] ss:$16 sps:$4 sm:$0xff]  }
  0xb8   :  { %1528 = vmatprep.subr.bf16.mxu1 %v3572_v36  ;;  %v3656_v36 = vld [vmem:[#allocation5 + $0x4] ss:$16 sps:$4 sm:$0xff]   ;;  %v3654_v45 = vld [vmem:[#allocation5] ss:$16 sps:$4 sm:$0xff]  }
  0xba   :  { %1492 = vmatpush1.bf16.msra.mxu0 %v3573_v47  ;;  %v3713_v47 = vld [vmem:[#allocation5 + $0x264] ss:$16 sps:$4 sm:$0xff]  }
  0xbb   :  { %1529 = vmatpush1.bf16.msra.mxu1 %v3570_v46  ;;  %1493 = vmatprep.subr.bf16.mxu0 %v3581_v49  ;;  %v3711_v46 = vld [vmem:[#allocation5 + $0x260] ss:$16 sps:$4 sm:$0xff]  }
  0xbc   :  { %1530 = vmatprep.subr.bf16.mxu1 %v3578_v48  ;;  %v3659_v48 = vld [vmem:[#allocation5 + $0x1e4] ss:$16 sps:$4 sm:$0xff]   ;;  %v3657_v49 = vld [vmem:[#allocation5 + $0x1e0] ss:$16 sps:$4 sm:$0xff]  }
  0xbe   :  { %1494 = vmatpush2.bf16.msra.mxu0 %v3579_v51  ;;  %v3719_v51 = vld [vmem:[#allocation5 + $0x244] ss:$16 sps:$4 sm:$0xff]  }
  0xbf   :  { %1531 = vmatpush1.bf16.msra.mxu1 %v3576_v50  ;;  %1495 = vmatprep.subr.bf16.mxu0 %v3587_v54  ;;  %v3717_v50 = vld [vmem:[#allocation5 + $0x240] ss:$16 sps:$4 sm:$0xff]  }
  0xc0   :  { %1532 = vmatprep.subr.bf16.mxu1 %v3584_v53  ;;  %v3662_v53 = vld [vmem:[#allocation5 + $0x1c4] ss:$16 sps:$4 sm:$0xff]   ;;  %v3660_v54 = vld [vmem:[#allocation5 + $0x1c0] ss:$16 sps:$4 sm:$0xff]  }
  0xc2   :  { %1496 = vmatpush2.bf16.msra.mxu0 %v3585_v56  ;;  %v3725_v56 = vld [vmem:[#allocation5 + $0x224] ss:$16 sps:$4 sm:$0xff]  }
  0xc3   :  { %1533 = vmatpush1.bf16.msra.mxu1 %v3582_v55  ;;  %1497 = vmatprep.subr.bf16.mxu0 %v3593_v58  ;;  %v3723_v55 = vld [vmem:[#allocation5 + $0x220] ss:$16 sps:$4 sm:$0xff]  }
  0xc4   :  { %1534 = vmatprep.subr.bf16.mxu1 %v3590_v57  ;;  %v3665_v57 = vld [vmem:[#allocation5 + $0x1a4] ss:$16 sps:$4 sm:$0xff]   ;;  %v3663_v58 = vld [vmem:[#allocation5 + $0x1a0] ss:$16 sps:$4 sm:$0xff]  }
  0xc6   :  { %1498 = vmatpush2.bf16.msra.mxu0 %v3591_v60  ;;  %v3731_v60 = vld [vmem:[#allocation5 + $0x204] ss:$16 sps:$4 sm:$0xff]  }
  0xc7   :  { %1535 = vmatpush2.bf16.msra.mxu1 %v3588_v59  ;;  %1499 = vmatprep.subr.bf16.mxu0 %v3599_v62  ;;  %v3729_v59 = vld [vmem:[#allocation5 + $0x200] ss:$16 sps:$4 sm:$0xff]  }
  0xc8   :  { %1536 = vmatprep.subr.bf16.mxu1 %v3596_v61  ;;  %v3668_v61 = vld [vmem:[#allocation5 + $0x184] ss:$16 sps:$4 sm:$0xff]   ;;  %v3666_v62 = vld [vmem:[#allocation5 + $0x180] ss:$16 sps:$4 sm:$0xff]  }
  0xca   :  { %1500 = vmatpush2.bf16.msra.mxu0 %v3597_v0  ;;  %v3737_v0 = vld [vmem:[#allocation5 + $0x3e4] ss:$16 sps:$4 sm:$0xff]  }
  0xcb   :  { %1537 = vmatpush2.bf16.msra.mxu1 %v3594_v63  ;;  %1501 = vmatprep.subr.bf16.mxu0 %v3605_v2  ;;  %v3735_v63 = vld [vmem:[#allocation5 + $0x3e0] ss:$16 sps:$4 sm:$0xff]  }
  0xcc   :  { %1538 = vmatprep.subr.bf16.mxu1 %v3602_v1  ;;  %v3671_v1 = vld [vmem:[#allocation5 + $0x164] ss:$16 sps:$4 sm:$0xff]   ;;  %v3669_v2 = vld [vmem:[#allocation5 + $0x160] ss:$16 sps:$4 sm:$0xff]  }
  0xce   :  { %1502 = vmatpush2.bf16.msra.mxu0 %v3603_v4  ;;  %v3743_v4 = vld [vmem:[#allocation5 + $0x3c4] ss:$16 sps:$4 sm:$0xff]  }
  0xcf   :  { %1539 = vmatpush2.bf16.msra.mxu1 %v3600_v3  ;;  %1503 = vmatprep.subr.bf16.mxu0 %v3611_v6  ;;  %v3741_v3 = vld [vmem:[#allocation5 + $0x3c0] ss:$16 sps:$4 sm:$0xff]  }
  0xd0   :  { %1540 = vmatprep.subr.bf16.mxu1 %v3608_v5  ;;  %v3674_v5 = vld [vmem:[#allocation5 + $0x144] ss:$16 sps:$4 sm:$0xff]   ;;  %v3672_v6 = vld [vmem:[#allocation5 + $0x140] ss:$16 sps:$4 sm:$0xff]  }
  0xd2   :  { %1504 = vmatpush2.bf16.msra.mxu0 %v3609_v10  ;;  %v3749_v10 = vld [vmem:[#allocation5 + $0x3a4] ss:$16 sps:$4 sm:$0xff]  }
  0xd3   :  { %1541 = vmatpush2.bf16.msra.mxu1 %v3606_v7  ;;  %1505 = vmatprep.subr.bf16.mxu0 %v3617_v12  ;;  %v3747_v7 = vld [vmem:[#allocation5 + $0x3a0] ss:$16 sps:$4 sm:$0xff]  }
  0xd4   :  { %1542 = vmatprep.subr.bf16.mxu1 %v3614_v11  ;;  %v3677_v11 = vld [vmem:[#allocation5 + $0x124] ss:$16 sps:$4 sm:$0xff]   ;;  %v3675_v12 = vld [vmem:[#allocation5 + $0x120] ss:$16 sps:$4 sm:$0xff]  }
  0xd6   :  { %1506 = vmatpush2.bf16.msra.mxu0 %v3615_v14  ;;  %v3755_v14 = vld [vmem:[#allocation5 + $0x384] ss:$16 sps:$4 sm:$0xff]  }
  0xd7   :  { %1543 = vmatpush2.bf16.msra.mxu1 %v3612_v13  ;;  %1507 = vmatprep.subr.bf16.mxu0 %v3623_v17  ;;  %v3753_v13 = vld [vmem:[#allocation5 + $0x380] ss:$16 sps:$4 sm:$0xff]  }
  0xd8   :  { %1544 = vmatprep.subr.bf16.mxu1 %v3620_v15  ;;  %v3680_v15 = vld [vmem:[#allocation5 + $0x104] ss:$16 sps:$4 sm:$0xff]  }
  0xda   :  { %1508 = vmatpush2.bf16.msra.mxu0 %v3621_v21  ;;  %v3678_v21 = vld [vmem:[#allocation5 + $0x100] ss:$16 sps:$4 sm:$0xff]  }
  0xdb   :  { %1545 = vmatpush2.bf16.msra.mxu1 %v3618_v18  ;;  %1573 = vmatprep.subr.bf16.mxu0 %v3629_v23 }
  0xdc   :  { %1546 = vmatprep.subr.bf16.mxu1 %v3626_v22  ;;  %v3761_v22 = vld [vmem:[#allocation5 + $0x364] ss:$16 sps:$4 sm:$0xff]  }
  0xdd   :  { %1510 = vmatmul.mubr.bf16.vlgmr.msra.gmra.mxu0 %v3995_v9  ;;  %v3644_v9 = vld [vmem:[#allocation5 + $0x84] ss:$16 sps:$4 sm:$0xff]  }
  0xde   :  { %1574 = vmatpush1.bf16.msra.mxu0 %v3627_v25  ;;  %1591 = vmatprep.mubr.bf16.mxu0 %v3927_v16  ;;  %v3687_v16 = vld [vmem:[#allocation5 + $0x2e0] ss:$16 sps:$4 sm:$0xff]   ;;  %v3683_v25 = vld [vmem:[#allocation5 + $0xec] ss:$16 sps:$4 sm:$0xff]  }
  0xdf   :  { %1547 = vmatpush2.bf16.msra.mxu1 %v3624_v24  ;;  %2398 = vmatprep.subr.bf16.mxu0 %v3635_v27 }
  0xe0   :  { %1548 = vmatprep.subr.bf16.mxu1 %v3632_v26  ;;  %v3759_v26 = vld [vmem:[#allocation5 + $0x360] ss:$16 sps:$4 sm:$0xff]  }
  0xe3   :  { %1549 = vmatpush2.bf16.msra.mxu1 %v3630_v28 }
  0xe4   :  { %2439 = vmatprep.subr.bf16.mxu1 %v3689_v35 }
  0xe5   :  { %3127 = vmatmul.mubr.msk.bf16.vlgmr.msra.gmra.mxu0 %vm1268_vm0, %v4003_v19  ;;  %v3650_v19 = vld [vmem:[#allocation5 + $0x44] ss:$16 sps:$4 sm:$0xff]  }
  0xe6   :  { %1551 = vmatmul.mubr.bf16.vlgmr.msra.gmra.mxu1 %v4017_v20  ;;  %2399 = vmatpush1.bf16.msra.mxu0 %v3633_v29  ;;  %v3645_v20 = vld [vmem:[#allocation5 + $0x60] ss:$16 sps:$4 sm:$0xff]   ;;  %v3767_v29 = vld [vmem:[#allocation5 + $0x344] ss:$16 sps:$4 sm:$0xff]  }
  0xe7   :  { %2400 = vmatprep.subr.bf16.mxu0 %v3638_v30  ;;  %2440 = vmatpush1.bf16.msra.mxu1 %v3687_v16  ;;  %v3771_v16 = vld [vmem:[#allocation5 + $0x320] ss:$16 sps:$4 sm:$0xff]  }
  0xe8   :  { %2441 = vmatprep.subr.bf16.mxu1 %v3695_v52  ;;  %v3779_v52 = vld [vmem:[#allocation5 + $0x2ec] ss:$16 sps:$4 sm:$0xff]  }
  0xea   :  { %2401 = vmatpush1.bf16.msra.mxu0 %v3636_v31 }
  0xeb   :  { %2402 = vmatprep.subr.bf16.mxu0 %v3641_v32  ;;  %2442 = vmatpush1.bf16.msra.mxu1 %v3693_v38  ;;  %v3765_v32 = vld [vmem:[#allocation5 + $0x340] ss:$16 sps:$4 sm:$0xff]  }
  0xec   :  { %2443 = vmatprep.subr.bf16.mxu1 %v3701_v8  ;;  %v3774_v38 = vld [vmem:[#allocation5 + $0x300] ss:$16 sps:$4 sm:$0xff]  }
  0xed   :  { %v4034_v8 = vld [vmem:[%s4180_s2] sm:$0xf] }
  0xee   :  { %2403 = vmatpush1.bf16.msra.mxu0 %v3639_v33 }
  0xef   :  { %2404 = vmatprep.subr.bf16.mxu0 %v3644_v9  ;;  %2444 = vmatpush1.bf16.msra.mxu1 %v3699_v40  ;;  %v3773_v9 = vld [vmem:[#allocation5 + $0x324] ss:$16 sps:$4 sm:$0xff]  }
  0xf0   :  { %2445 = vmatprep.subr.bf16.mxu1 %v3707_v44 }
  0xf2   :  { %2405 = vmatpush1.bf16.msra.mxu0 %v3642_v34 }
  0xf3   :  { %2406 = vmatprep.subr.bf16.mxu0 %v3647_v37  ;;  %2446 = vmatpush1.bf16.msra.mxu1 %v3705_v43  ;;  %v3776_v37 = vld [vmem:[#allocation5 + $0x304] ss:$16 sps:$4 sm:$0xff]  }
  0xf4   :  { %2447 = vmatprep.subr.bf16.mxu1 %v3713_v47 }
  0xf6   :  { %2407 = vmatpush1.bf16.msra.mxu0 %v3645_v20 }
  0xf7   :  { %2408 = vmatprep.subr.bf16.mxu0 %v3650_v19  ;;  %2448 = vmatpush1.bf16.msra.mxu1 %v3711_v46  ;;  %v268_v19 = vlaneseq }
  0xf8   :  { %2449 = vmatprep.subr.bf16.mxu1 %v3719_v51 }
  0xfa   :  { %2409 = vmatpush1.bf16.msra.mxu0 %v3648_v39  ;;  %v4028_v39 = vshrl.u32 %v268_v19, 7 }
  0xfb   :  { %2410 = vmatprep.subr.bf16.mxu0 %v3653_v41  ;;  %2450 = vmatpush1.bf16.msra.mxu1 %v3717_v50 }
  0xfc   :  { %2451 = vmatprep.subr.bf16.mxu1 %v3725_v56  ;;  %v270_v40 = vsub.s32 0, %v4028_v39  ;;  %v274_v41 = vsub.s32 1, %v4028_v39 }
  0xfe   :  { %2411 = vmatpush1.bf16.msra.mxu0 %v3651_v42  ;;  %v271_v42 = vrot.slane %v4034_v8, %v270_v40  ;;  %v275_v43 = vrot.slane %v4034_v8, %v274_v41 }
  0xff   :  { %2412 = vmatprep.subr.bf16.mxu0 %v3656_v36  ;;  %2452 = vmatpush1.bf16.msra.mxu1 %v3723_v55 }
 0x100   :  { %2453 = vmatprep.subr.bf16.mxu1 %v3731_v60  ;;  %v3681_v60 = vld [vmem:[#allocation5 + $0xe8] ss:$16 sps:$4 sm:$0xff]  }
 0x102   :  { %2413 = vmatpush1.bf16.msra.mxu0 %v3654_v45 }
 0x103   :  { %2414 = vmatprep.subr.bf16.mxu0 %v3659_v48  ;;  %2454 = vmatpush1.bf16.msra.mxu1 %v3729_v59 }
 0x104   :  { %2455 = vmatprep.subr.bf16.mxu1 %v3737_v0 }
 0x106   :  { %2415 = vmatpush2.bf16.msra.mxu0 %v3657_v49 }
 0x107   :  { %2416 = vmatprep.subr.bf16.mxu0 %v3662_v53  ;;  %2456 = vmatpush2.bf16.msra.mxu1 %v3735_v63  ;;  %v3686_v63 = vld [vmem:[#allocation5 + $0xcc] ss:$16 sps:$4 sm:$0xff]  }
 0x108   :  { %2457 = vmatprep.subr.bf16.mxu1 %v3743_v4  ;;  %v3690_v4 = vld [vmem:[#allocation5 + $0xa8] ss:$16 sps:$4 sm:$0xff]  }
 0x10a   :  { %2417 = vmatpush2.bf16.msra.mxu0 %v3660_v54 }
 0x10b   :  { %2418 = vmatprep.subr.bf16.mxu0 %v3665_v57  ;;  %2458 = vmatpush2.bf16.msra.mxu1 %v3741_v3  ;;  %v3692_v3 = vld [vmem:[#allocation5 + $0xac] ss:$16 sps:$4 sm:$0xff]  }
 0x10c   :  { %2459 = vmatprep.subr.bf16.mxu1 %v3749_v10  ;;  %v3702_v10 = vld [vmem:[#allocation5 + $0x68] ss:$16 sps:$4 sm:$0xff]  }
 0x10e   :  { %2419 = vmatpush2.bf16.msra.mxu0 %v3663_v58 }
 0x10f   :  { %2420 = vmatprep.subr.bf16.mxu0 %v3668_v61  ;;  %2460 = vmatpush2.bf16.msra.mxu1 %v3747_v7  ;;  %v3704_v7 = vld [vmem:[#allocation5 + $0x6c] ss:$16 sps:$4 sm:$0xff]  }
 0x110   :  { %2461 = vmatprep.subr.bf16.mxu1 %v3755_v14  ;;  %v3714_v14 = vld [vmem:[#allocation5 + $0x28] ss:$16 sps:$4 sm:$0xff]  }
 0x112   :  { %2421 = vmatpush2.bf16.msra.mxu0 %v3666_v62 }
 0x113   :  { %2422 = vmatprep.subr.bf16.mxu0 %v3671_v1  ;;  %2462 = vmatpush2.bf16.msra.mxu1 %v3753_v13  ;;  %v3684_v1 = vld [vmem:[#allocation5 + $0xc8] ss:$16 sps:$4 sm:$0xff]   ;;  %v3716_v13 = vld [vmem:[#allocation5 + $0x2c] ss:$16 sps:$4 sm:$0xff]  }
 0x114   :  { %2463 = vmatprep.subr.bf16.mxu1 %v3761_v22  ;;  %v3734_v22 = vld [vmem:[#allocation5 + $0x1cc] ss:$16 sps:$4 sm:$0xff]  }
 0x116   :  { %2423 = vmatpush2.bf16.msra.mxu0 %v3669_v2 }
 0x117   :  { %2424 = vmatprep.subr.bf16.mxu0 %v3674_v5  ;;  %2464 = vmatpush2.bf16.msra.mxu1 %v3759_v26  ;;  %v3698_v5 = vld [vmem:[#allocation5 + $0x8c] ss:$16 sps:$4 sm:$0xff]  }
 0x118   :  { %2465 = vmatprep.subr.bf16.mxu1 %v3767_v29  ;;  %v3746_v26 = vld [vmem:[#allocation5 + $0x18c] ss:$16 sps:$4 sm:$0xff]   ;;  %v3750_v29 = vld [vmem:[#allocation5 + $0x168] ss:$16 sps:$4 sm:$0xff]  }
 0x11a   :  { %2425 = vmatpush2.bf16.msra.mxu0 %v3672_v6  ;;  %v3696_v6 = vld [vmem:[#allocation5 + $0x88] ss:$16 sps:$4 sm:$0xff]  }
 0x11b   :  { %2426 = vmatprep.subr.bf16.mxu0 %v3677_v11  ;;  %2466 = vmatpush2.bf16.msra.mxu1 %v3765_v32  ;;  %v3710_v11 = vld [vmem:[#allocation5 + $0x4c] ss:$16 sps:$4 sm:$0xff]   ;;  %v3756_v32 = vld [vmem:[#allocation5 + $0x148] ss:$16 sps:$4 sm:$0xff]  }
 0x11c   :  { %2467 = vmatprep.subr.bf16.mxu1 %v3773_v9  ;;  %v282_v9 = vsub.s32 3, %v4028_v39 }
 0x11d   :  { %v1306_v17 = vpop.f32.mrf.mxu0 }
 0x11e   :  { %v1347_v18 = vpop.f32.mrf.mxu1  ;;  %2427 = vmatpush2.bf16.msra.mxu0 %v3675_v12  ;;  %v1307_v44 = vadd.f32 %v1306_v17, %v271_v42  ;;  %v3708_v12 = vld [vmem:[#allocation5 + $0x48] ss:$16 sps:$4 sm:$0xff]  }
 0x11f   :  { %v1308_v23 = vpop.f32.mrf.mxu0  ;;  %2428 = vmatprep.subr.bf16.mxu0 %v3680_v15  ;;  %2468 = vmatpush2.bf16.msra.mxu1 %v3771_v16  ;;  %v3722_v15 = vld [vmem:[#allocation5 + $0xc] ss:$16 sps:$4 sm:$0xff]   ;;  %v3720_v17 = vld [vmem:[#allocation5 + $0x8] ss:$16 sps:$4 sm:$0xff]  }
 0x120   :  { %v1349_v24 = vpop.f32.mrf.mxu1  ;;  %2469 = vmatprep.subr.bf16.mxu1 %v3776_v37  ;;  %v1309_v36 = vadd.f32 %v1308_v23, %v275_v43  ;;  %v1348_v45 = vadd.f32 %v1347_v18, %v1307_v44  ;;  %v3728_v18 = vld [vmem:[#allocation5 + $0x1ec] ss:$16 sps:$4 sm:$0xff]   ;;  %v3732_v23 = vld [vmem:[#allocation5 + $0x1c8] ss:$16 sps:$4 sm:$0xff]  }
 0x121   :  { %v1310_v27 = vpop.f32.mrf.mxu0  ;;  %v3768_v42 = vld [vmem:[#allocation5 + $0x108] ss:$16 sps:$4 sm:$0xff]  }
 0x122   :  { %v1351_v28 = vpop.f32.mrf.mxu1  ;;  %2429 = vmatpush2.bf16.msra.mxu0 %v3678_v21  ;;  %v1350_v47 = vadd.f32 %v1349_v24, %v1309_v36  ;;  %v3726_v21 = vld [vmem:[#allocation5 + $0x1e8] ss:$16 sps:$4 sm:$0xff]   ;;  %v3740_v24 = vld [vmem:[#allocation5 + $0x1ac] ss:$16 sps:$4 sm:$0xff]  }
 0x123   :  { %v1311_v30 = vpop.f32.mrf.mxu0  ;;  %2480 = vmatprep.subr.bf16.mxu0 %v3683_v25  ;;  %2470 = vmatpush2.bf16.msra.mxu1 %v3774_v38  ;;  %v3738_v25 = vld [vmem:[#allocation5 + $0x1a8] ss:$16 sps:$4 sm:$0xff]   ;;  %v3752_v28 = vld [vmem:[#allocation5 + $0x16c] ss:$16 sps:$4 sm:$0xff]   ;;  %v283_v38 = vrot.slane %v4034_v8, %v282_v9 }
 0x124   :  { %v1352_v31 = vpop.f32.mrf.mxu1  ;;  %2521 = vmatprep.subr.bf16.mxu1 %v3779_v52  ;;  %v3744_v27 = vld [vmem:[#allocation5 + $0x188] ss:$16 sps:$4 sm:$0xff]   ;;  %v3758_v30 = vld [vmem:[#allocation5 + $0x14c] ss:$16 sps:$4 sm:$0xff]  }
 0x125   :  { %v278_v31 = vsub.s32 2, %v4028_v39 }
 0x126   :  { %v1429_v33 = vpop.f32.mrf.mxu1 }
 0x127   :  { %v279_v16 = vrot.slane %v4034_v8, %v278_v31 }
 0x128   :  { %v1431_v34 = vpop.f32.mrf.mxu1 }
 0x12a   :  { %v1433_v35 = vpop.f32.mrf.mxu1 }
 0x12b   :  { %v3762_v35 = vld [vmem:[#allocation5 + $0x128] ss:$16 sps:$4 sm:$0xff]  }
 0x12c   :  { %v1434_v20 = vpop.f32.mrf.mxu1 }
 0x12d   :  { %v3770_v20 = vld [vmem:[#allocation5 + $0x10c] ss:$16 sps:$4 sm:$0xff]  }
 0x15d   :  { %v1388_v46 = vpop.f32.mrf.mxu0 }
 0x15e   :  { %v1389_v48 = vadd.f32 %v1388_v46, %v1348_v45 }
 0x15f   :  { %v1390_v49 = vpop.f32.mrf.mxu0 }
 0x160   :  { %v1430_v50 = vadd.f32 %v1429_v33, %v1389_v48  ;;  %v1391_v51 = vadd.f32 %v1390_v49, %v1350_v47  ;;  %v3764_v33 = vld [vmem:[#allocation5 + $0x12c] ss:$16 sps:$4 sm:$0xff]  }
 0x161   :  { %v1392_v53 = vpop.f32.mrf.mxu0 }
 0x162   :  { %v1432_v54 = vadd.f32 %v1431_v34, %v1391_v51  ;;  %v1600_v55 = vmax.f32 %v1430_v50, 0.0 }
 0x163   :  { %v1393_v56 = vpop.f32.mrf.mxu0 }
 0x164   :  { %v1601_v57 = vmax.f32 %v1432_v54, 0.0  ;;  %v4045_v61 = vpack.c.bf16 %v1600_v55, %v1600_v55 }
 0x166   :  { %v4043_v58 = vpop.f32.mrf.mxu1  ;;  %v1605_v59 = vpack.c.bf16 %v1601_v57, %v1601_v57 }
 0x167   :  { %v1471_v19 = vadd.f32 %v4043_v58, %v279_v16  ;;  %v3815_v16 = vld [vmem:[#allocation5 + $0x36c] ss:$16 sps:$4 sm:$0xff]  }
 0x168   :  { %v4047_v62 = vpop.f32.mrf.mxu1  ;;  %2430 = vmatprep.mubr.bf16.mxu0 %v1605_v59 }
 0x169   :  { %2431 = vmatmul.mubr.bf16.vlgmr.msra.gmra.mxu0 %v4045_v61  ;;  %v1473_v44 = vadd.f32 %v4047_v62, %v283_v38  ;;  %v3777_v62 = vld [vmem:[#allocation5 + $0x2e8] ss:$16 sps:$4 sm:$0xff]   ;;  %v3821_v38 = vld [vmem:[#allocation5 + $0x32c] ss:$16 sps:$4 sm:$0xff]  }
 0x16a   :  { %v1474_v0 = vpop.f32.mrf.mxu1  ;;  %2481 = vmatpush1.bf16.msra.mxu0 %v3681_v60  ;;  %2512 = vmatprep.mubr.bf16.mxu0 %v1605_v59 }
 0x16b   :  { %2482 = vmatprep.subr.bf16.mxu0 %v3686_v63  ;;  %v3782_v0 = vld [vmem:[#allocation5 + $0x2cc] ss:$16 sps:$4 sm:$0xff]  }
 0x16c   :  { %v1475_v2 = vpop.f32.mrf.mxu1 }
 0x16d   :  { %v3826_v2 = vld [vmem:[%s4183_s5 + $0x38] sm:$0xff]  }
 0x16e   :  { %2483 = vmatpush1.bf16.msra.mxu0 %v3684_v1  ;;  %v3825_v1 = vld [vmem:[%s4183_s5 + $0x78] sm:$0xff]  }
 0x16f   :  { %2484 = vmatprep.subr.bf16.mxu0 %v3692_v3  ;;  %v3780_v3 = vld [vmem:[#allocation5 + $0x2c8] ss:$16 sps:$4 sm:$0xff]  }
 0x172   :  { %2485 = vmatpush1.bf16.msra.mxu0 %v3690_v4  ;;  %v3785_v4 = vld [vmem:[#allocation5 + $0x2ac] ss:$16 sps:$4 sm:$0xff]  }
 0x173   :  { %2486 = vmatprep.subr.bf16.mxu0 %v3698_v5  ;;  %v3828_v5 = vld [vmem:[%s4183_s5 + $0x30] sm:$0xff]  }
 0x176   :  { %2487 = vmatpush1.bf16.msra.mxu0 %v3696_v6  ;;  %v3829_v6 = vld [vmem:[%s4183_s5 + $0x68] sm:$0xff]  }
 0x177   :  { %2488 = vmatprep.subr.bf16.mxu0 %v3704_v7  ;;  %v3783_v7 = vld [vmem:[#allocation5 + $0x2a8] ss:$16 sps:$4 sm:$0xff]  }
 0x17a   :  { %2489 = vmatpush1.bf16.msra.mxu0 %v3702_v10  ;;  %v3788_v10 = vld [vmem:[#allocation5 + $0x28c] ss:$16 sps:$4 sm:$0xff]  }
 0x17b   :  { %2490 = vmatprep.subr.bf16.mxu0 %v3710_v11  ;;  %v3830_v11 = vld [vmem:[%s4183_s5 + $0x28] sm:$0xff]  }
 0x17e   :  { %2491 = vmatpush1.bf16.msra.mxu0 %v3708_v12  ;;  %v3831_v12 = vld [vmem:[%s4183_s5 + $0x60] sm:$0xff]  }
 0x17f   :  { %2492 = vmatprep.subr.bf16.mxu0 %v3716_v13  ;;  %v3786_v13 = vld [vmem:[#allocation5 + $0x288] ss:$16 sps:$4 sm:$0xff]  }
 0x182   :  { %2493 = vmatpush1.bf16.msra.mxu0 %v3714_v14  ;;  %v3791_v14 = vld [vmem:[#allocation5 + $0x26c] ss:$16 sps:$4 sm:$0xff]  }
 0x183   :  { %2494 = vmatprep.subr.bf16.mxu0 %v3722_v15  ;;  %v3832_v15 = vld [vmem:[%s4183_s5 + $0x20] sm:$0xff]  }
 0x186   :  { %2495 = vmatpush1.bf16.msra.mxu0 %v3720_v17  ;;  %v3789_v17 = vld [vmem:[#allocation5 + $0x268] ss:$16 sps:$4 sm:$0xff]  }
 0x187   :  { %2496 = vmatprep.subr.bf16.mxu0 %v3728_v18  ;;  %v3794_v18 = vld [vmem:[#allocation5 + $0x24c] ss:$16 sps:$4 sm:$0xff]  }
 0x18a   :  { %2497 = vmatpush2.bf16.msra.mxu0 %v3726_v21  ;;  %v3792_v21 = vld [vmem:[#allocation5 + $0x248] ss:$16 sps:$4 sm:$0xff]  }
 0x18b   :  { %2498 = vmatprep.subr.bf16.mxu0 %v3734_v22  ;;  %v3797_v22 = vld [vmem:[#allocation5 + $0x22c] ss:$16 sps:$4 sm:$0xff]  }
 0x18e   :  { %2499 = vmatpush2.bf16.msra.mxu0 %v3732_v23  ;;  %v3795_v23 = vld [vmem:[#allocation5 + $0x228] ss:$16 sps:$4 sm:$0xff]  }
 0x18f   :  { %2500 = vmatprep.subr.bf16.mxu0 %v3740_v24  ;;  %v3800_v24 = vld [vmem:[#allocation5 + $0x20c] ss:$16 sps:$4 sm:$0xff]  }
 0x192   :  { %2501 = vmatpush2.bf16.msra.mxu0 %v3738_v25  ;;  %v3798_v25 = vld [vmem:[#allocation5 + $0x208] ss:$16 sps:$4 sm:$0xff]  }
 0x193   :  { %2502 = vmatprep.subr.bf16.mxu0 %v3746_v26  ;;  %v3803_v26 = vld [vmem:[#allocation5 + $0x3ec] ss:$16 sps:$4 sm:$0xff]  }
 0x196   :  { %2503 = vmatpush2.bf16.msra.mxu0 %v3744_v27  ;;  %v3801_v27 = vld [vmem:[#allocation5 + $0x3e8] ss:$16 sps:$4 sm:$0xff]  }
 0x197   :  { %2504 = vmatprep.subr.bf16.mxu0 %v3752_v28  ;;  %v3806_v28 = vld [vmem:[#allocation5 + $0x3cc] ss:$16 sps:$4 sm:$0xff]  }
 0x19a   :  { %2505 = vmatpush2.bf16.msra.mxu0 %v3750_v29  ;;  %v3804_v29 = vld [vmem:[#allocation5 + $0x3c8] ss:$16 sps:$4 sm:$0xff]  }
 0x19b   :  { %2506 = vmatprep.subr.bf16.mxu0 %v3758_v30  ;;  %v3809_v30 = vld [vmem:[#allocation5 + $0x3ac] ss:$16 sps:$4 sm:$0xff]  }
 0x19d   :  { %v1511_v34 = vpop.f32.mrf.mxu0 }
 0x19e   :  { %2507 = vmatpush2.bf16.msra.mxu0 %v3756_v32  ;;  %v1512_v36 = vadd.f32 %v1511_v34, %v1471_v19  ;;  %v3807_v32 = vld [vmem:[#allocation5 + $0x3a8] ss:$16 sps:$4 sm:$0xff]   ;;  %v3824_v19 = vld [vmem:[#allocation5 + $0x30c] ss:$16 sps:$4 sm:$0xff]  }
 0x19f   :  { %v1513_v37 = vpop.f32.mrf.mxu0  ;;  %2508 = vmatprep.subr.bf16.mxu0 %v3764_v33  ;;  %v3812_v33 = vld [vmem:[#allocation5 + $0x38c] ss:$16 sps:$4 sm:$0xff]   ;;  %v3810_v34 = vld [vmem:[#allocation5 + $0x388] ss:$16 sps:$4 sm:$0xff]  }
 0x1a0   :  { %v1514_v47 = vadd.f32 %v1513_v37, %v1473_v44  ;;  %v3818_v37 = vld [vmem:[#allocation5 + $0x34c] ss:$16 sps:$4 sm:$0xff]  }
 0x1a1   :  { %v1515_v52 = vpop.f32.mrf.mxu0  ;;  %v3834_v44 = vld [vmem:[%s4183_s5 + $0x18] sm:$0xff]  }
 0x1a2   :  { %2509 = vmatpush2.bf16.msra.mxu0 %v3762_v35  ;;  %v3813_v35 = vld [vmem:[#allocation5 + $0x368] ss:$16 sps:$4 sm:$0xff]  }
 0x1a3   :  { %v1516_v43 = vpop.f32.mrf.mxu0  ;;  %2510 = vmatprep.subr.bf16.mxu0 %v3770_v20  ;;  %v3816_v20 = vld [vmem:[#allocation5 + $0x348] ss:$16 sps:$4 sm:$0xff]  }
 0x1a4   :  { %v3819_v52 = vld [vmem:[#allocation5 + $0x328] ss:$16 sps:$4 sm:$0xff]  }
 0x1a5   :  { %v1593_v46 = vpop.f32.mrf.mxu0  ;;  %v3833_v43 = vld [vmem:[%s4183_s5 + $0x58] sm:$0xff]  }
 0x1a6   :  { %v1552_v45 = vpop.f32.mrf.mxu1  ;;  %2511 = vmatpush2.bf16.msra.mxu0 %v3768_v42  ;;  %v3822_v42 = vld [vmem:[#allocation5 + $0x308] ss:$16 sps:$4 sm:$0xff]  }
 0x1a7   :  { %v1553_v48 = vadd.f32 %v1552_v45, %v1512_v36  ;;  %v1595_v50 = vpop.f32.mrf.mxu0  ;;  %3289 = vmatprep.subr.bf16.mxu0 %v3825_v1  ;;  %v3835_v36 = vld [vmem:[%s4183_s5 + $0x50] sm:$0xff]  }
 0x1a8   :  { %v1554_v49 = vpop.f32.mrf.mxu1  ;;  %v3836_v45 = vld [vmem:[%s4183_s5 + $0x10] sm:$0xff]  }
 0x1a9   :  { %v1594_v51 = vadd.f32 %v1593_v46, %v1553_v48  ;;  %v1555_v53 = vadd.f32 %v1554_v49, %v1514_v47  ;;  %2513 = vmatmul.mubr.bf16.vlgmr.msra.gmra.mxu0 %v4045_v61  ;;  %v1597_v54 = vpop.f32.mrf.mxu0  ;;  %v3827_v61 = vld [vmem:[%s4183_s5 + $0x70] sm:$0xff]   ;;  %v3837_v46 = vld [vmem:[%s4183_s5 + $0x48] sm:$0xff]   ;;  %v3839_v48 = vld [vmem:[%s4183_s5 + $0x40] sm:$0xff]  }
 0x1aa   :  { %v1556_v8 = vpop.f32.mrf.mxu1  ;;  %3290 = vmatpush3.bf16.msra.mxu0 %v3826_v2  ;;  %v3838_v47 = vld [vmem:[%s4183_s5 + $0x8] sm:$0xff]   ;;  %v3840_v49 = vld [vmem:[%s4183_s5] sm:$0xff]  }
 0x1ab   :  { %v1596_v55 = vadd.f32 %v1595_v50, %v1555_v53  ;;  %v1602_v56 = vmax.f32 %v1594_v51, 0.0  ;;  %v1598_v58 = vpop.f32.mrf.mxu0  ;;  %3291 = vmatprep.subr.bf16.mxu0 %v3827_v61  ;;  %v3841_v50 = vld [vmem:[%s4183_s5 + $0xf8] sm:$0xff]   ;;  %v3843_v53 = vld [vmem:[%s4183_s5 + $0xf0] sm:$0xff]   ;;  %v3845_v54 = vld [vmem:[%s4183_s5 + $0xe8] sm:$0xff]  }
 0x1ac   :  { %v1557_v57 = vpop.f32.mrf.mxu1  ;;  %v3842_v51 = vld [vmem:[%s4183_s5 + $0xb8] sm:$0xff]   ;;  %v3844_v8 = vld [vmem:[%s4183_s5 + $0xb0] sm:$0xff]   ;;  %v3853_v61 = vld [vmem:[%s4183_s5 + $0xc8] sm:$0xff]  }
 0x1ad   :  { %v1603_v59 = vmax.f32 %v1596_v55, 0.0  ;;  %v4061_v63 = vpack.c.bf16 %v1602_v56, %v1602_v56  ;;  %v3846_v55 = vld [vmem:[%s4183_s5 + $0xa8] sm:$0xff]   ;;  %v3847_v56 = vld [vmem:[%s4183_s5 + $0xe0] sm:$0xff]   ;;  %v3849_v58 = vld [vmem:[%s4183_s5 + $0xd8] sm:$0xff]  }
 0x1ae   :  { %3292 = vmatpush3.bf16.msra.mxu0 %v3828_v5  ;;  %v3848_v57 = vld [vmem:[%s4183_s5 + $0xa0] sm:$0xff]  }
 0x1af   :  { %v1607_v60 = vpack.c.bf16 %v1603_v59, %v1603_v59  ;;  %3293 = vmatprep.subr.bf16.mxu0 %v3829_v6  ;;  %v3850_v59 = vld [vmem:[%s4183_s5 + $0x98] sm:$0xff]   ;;  %v3856_v5 = vld [vmem:[%s4183_s5 + $0x80] sm:$0xff]  }
 0x1b0   :  { %v1736_v6 = vld [vmem:[%s4182_s4] sm:$0xf] }
 0x1b1   :  { %2471 = vmatprep.mubr.bf16.mxu1 %v1607_v60 }
 0x1b2   :  { %2472 = vmatmul.mubr.bf16.vlgmr.msra.gmra.mxu1 %v4061_v63  ;;  %3294 = vmatpush3.bf16.msra.mxu0 %v3830_v11  ;;  %v1741_v11 = vrot.slane %v1736_v6, %v270_v40  ;;  %v1749_v40 = vrot.slane %v1736_v6, %v278_v31 }
 0x1b3   :  { %2522 = vmatpush1.bf16.msra.mxu1 %v3777_v62  ;;  %2553 = vmatprep.mubr.bf16.mxu1 %v1607_v60  ;;  %v3851_v60 = vld [vmem:[%s4183_s5 + $0xd0] sm:$0xff]  }
 0x1b4   :  { %2523 = vmatprep.subr.bf16.mxu1 %v3782_v0  ;;  %3295 = vmatprep.subr.bf16.mxu0 %v3831_v12  ;;  %v3852_v62 = vld [vmem:[%s4183_s5 + $0x90] sm:$0xff]  }
 0x1b6   :  { %3296 = vmatpush3.bf16.msra.mxu0 %v3832_v15 }
 0x1b7   :  { %2524 = vmatpush1.bf16.msra.mxu1 %v3780_v3  ;;  %3297 = vmatprep.subr.bf16.mxu0 %v3833_v43  ;;  %v3854_v3 = vld [vmem:[%s4183_s5 + $0x88] sm:$0xff]  }
 0x1b8   :  { %2525 = vmatprep.subr.bf16.mxu1 %v3785_v4  ;;  %v3855_v4 = vld [vmem:[%s4183_s5 + $0xc0] sm:$0xff]  }
 0x1ba   :  { %3298 = vmatpush3.bf16.msra.mxu0 %v3834_v44 }
 0x1bb   :  { %2526 = vmatpush1.bf16.msra.mxu1 %v3783_v7  ;;  %3299 = vmatprep.subr.bf16.mxu0 %v3835_v36 }
 0x1bc   :  { %2527 = vmatprep.subr.bf16.mxu1 %v3788_v10 }
 0x1be   :  { %3300 = vmatpush3.bf16.msra.mxu0 %v3836_v45 }
 0x1bf   :  { %2528 = vmatpush1.bf16.msra.mxu1 %v3786_v13  ;;  %3301 = vmatprep.subr.bf16.mxu0 %v3837_v46  ;;  %v1745_v13 = vrot.slane %v1736_v6, %v274_v41  ;;  %v1753_v41 = vrot.slane %v1736_v6, %v282_v9  ;;  %v3256_v9 = vld [vmem:[%s4184_s6] ss:$0 sm:$0xff] }
 0x1c0   :  { %2529 = vmatprep.subr.bf16.mxu1 %v3791_v14 }
 0x1c2   :  { %3302 = vmatpush3.bf16.msra.mxu0 %v3838_v47 }
 0x1c3   :  { %2530 = vmatpush1.bf16.msra.mxu1 %v3789_v17  ;;  %3303 = vmatprep.subr.bf16.mxu0 %v3839_v48 }
 0x1c4   :  { %2531 = vmatprep.subr.bf16.mxu1 %v3794_v18 }
 0x1c6   :  { %3304 = vmatpush3.bf16.msra.mxu0 %v3840_v49 }
 0x1c7   :  { %2532 = vmatpush1.bf16.msra.mxu1 %v3792_v21 }
 0x1c8   :  { %2533 = vmatprep.subr.bf16.mxu1 %v3797_v22 }
 0x1cb   :  { %2534 = vmatpush1.bf16.msra.mxu1 %v3795_v23 }
 0x1cc   :  { %2535 = vmatprep.subr.bf16.mxu1 %v3800_v24 }
 0x1cf   :  { %2536 = vmatpush1.bf16.msra.mxu1 %v3798_v25 }
 0x1d0   :  { %2537 = vmatprep.subr.bf16.mxu1 %v3803_v26 }
 0x1d3   :  { %2538 = vmatpush2.bf16.msra.mxu1 %v3801_v27 }
 0x1d4   :  { %2539 = vmatprep.subr.bf16.mxu1 %v3806_v28 }
 0x1d7   :  { %2540 = vmatpush2.bf16.msra.mxu1 %v3804_v29 }
 0x1d8   :  { %2541 = vmatprep.subr.bf16.mxu1 %v3809_v30 }
 0x1db   :  { %2542 = vmatpush2.bf16.msra.mxu1 %v3807_v32 }
 0x1dc   :  { %2543 = vmatprep.subr.bf16.mxu1 %v3812_v33 }
 0x1df   :  { %2544 = vmatpush2.bf16.msra.mxu1 %v3810_v34 }
 0x1e0   :  { %2545 = vmatprep.subr.bf16.mxu1 %v3815_v16 }
 0x1e3   :  { %2546 = vmatpush2.bf16.msra.mxu1 %v3813_v35 }
 0x1e4   :  { %2547 = vmatprep.subr.bf16.mxu1 %v3818_v37 }
 0x1e7   :  { %2548 = vmatpush2.bf16.msra.mxu1 %v3816_v20 }
 0x1e8   :  { %2549 = vmatprep.subr.bf16.mxu1 %v3821_v38 }
 0x1eb   :  { %2550 = vmatpush2.bf16.msra.mxu1 %v3819_v52 }
 0x1ec   :  { %2551 = vmatprep.subr.bf16.mxu1 %v3824_v19 }
 0x1ef   :  { %2552 = vmatpush2.bf16.msra.mxu1 %v3822_v42 }
 0x1f0   :  { %3311 = vmatprep.subr.bf16.mxu1 %v3841_v50 }
 0x1f2   :  { %2554 = vmatmul.mubr.bf16.vlgmr.msra.gmra.mxu1 %v4061_v63 }
 0x1f3   :  { %3312 = vmatpush3.bf16.msra.mxu1 %v3842_v51 }
 0x1f4   :  { %3313 = vmatprep.subr.bf16.mxu1 %v3843_v53 }
 0x1f7   :  { %3314 = vmatpush3.bf16.msra.mxu1 %v3844_v8 }
 0x1f8   :  { %3315 = vmatprep.subr.bf16.mxu1 %v3845_v54 }
 0x1fb   :  { %3316 = vmatpush3.bf16.msra.mxu1 %v3846_v55 }
 0x1fc   :  { %3317 = vmatprep.subr.bf16.mxu1 %v3847_v56 }
 0x1ff   :  { %3318 = vmatpush3.bf16.msra.mxu1 %v3848_v57 }
 0x200   :  { %3319 = vmatprep.subr.bf16.mxu1 %v3849_v58 }
 0x203   :  { %3320 = vmatpush3.bf16.msra.mxu1 %v3850_v59 }
 0x204   :  { %3321 = vmatprep.subr.bf16.mxu1 %v3851_v60 }
 0x207   :  { %3322 = vmatpush3.bf16.msra.mxu1 %v3852_v62 }
 0x208   :  { %3323 = vmatprep.subr.bf16.mxu1 %v3853_v61 }
 0x20b   :  { %3324 = vmatpush3.bf16.msra.mxu1 %v3854_v3 }
 0x20c   :  { %3325 = vmatprep.subr.bf16.mxu1 %v3855_v4 }
 0x20f   :  { %3326 = vmatpush3.bf16.msra.mxu1 %v3856_v5 }
 0x229   :  { %v2432_v63 = vpop.f32.mrf.mxu0 }
 0x22a   :  { %v2433_v15 = vadd.f32 %v2432_v63, %v1741_v11 }
 0x22b   :  { %v2434_v0 = vpop.f32.mrf.mxu0 }
 0x22c   :  { %v2435_v18 = vadd.f32 %v2434_v0, %v1745_v13 }
 0x22d   :  { %v2436_v1 = vpop.f32.mrf.mxu0 }
 0x22f   :  { %v2437_v2 = vpop.f32.mrf.mxu0 }
 0x269   :  { %v2514_v7 = vpop.f32.mrf.mxu0 }
 0x26a   :  { %v2515_v30 = vadd.f32 %v2514_v7, %v1749_v40 }
 0x26b   :  { %v2516_v10 = vpop.f32.mrf.mxu0 }
 0x26c   :  { %v2517_v33 = vadd.f32 %v2516_v10, %v1753_v41 }
 0x26d   :  { %v2518_v12 = vpop.f32.mrf.mxu0 }
 0x26f   :  { %v2519_v14 = vpop.f32.mrf.mxu0 }
 0x272   :  { %v2473_v17 = vpop.f32.mrf.mxu1 }
 0x273   :  { %v2474_v21 = vadd.f32 %v2473_v17, %v2433_v15 }
 0x274   :  { %v2475_v22 = vpop.f32.mrf.mxu1 }
 0x275   :  { %v2476_v23 = vadd.f32 %v2475_v22, %v2435_v18  ;;  %v2562_v24 = vmax.f32 %v2474_v21, 0.0 }
 0x276   :  { %v2477_v25 = vpop.f32.mrf.mxu1 }
 0x277   :  { %v2563_v26 = vmax.f32 %v2476_v23, 0.0  ;;  %v2566_v29 = vpack.c.bf16 %v2562_v24, %v2562_v24 }
 0x278   :  { %v2478_v27 = vpop.f32.mrf.mxu1 }
 0x279   :  { %v2567_v28 = vpack.c.bf16 %v2563_v26, %v2563_v26 }
 0x27b   :  { %2865 = vmatprep.mubr.bf16.mxu0 %v2567_v28 }
 0x27c   :  { %2866 = vmatmul.mubr.bf16.vlgmr.msra.gmra.mxu0 %v2566_v29 }
 0x2b2   :  { %v2555_v32 = vpop.f32.mrf.mxu1 }
 0x2b3   :  { %v2556_v34 = vadd.f32 %v2555_v32, %v2515_v30 }
 0x2b4   :  { %v2557_v16 = vpop.f32.mrf.mxu1 }
 0x2b5   :  { %v2558_v35 = vadd.f32 %v2557_v16, %v2517_v33  ;;  %v2564_v37 = vmax.f32 %v2556_v34, 0.0 }
 0x2b6   :  { %v2559_v20 = vpop.f32.mrf.mxu1 }
 0x2b7   :  { %v2565_v38 = vmax.f32 %v2558_v35, 0.0  ;;  %v2568_v42 = vpack.c.bf16 %v2564_v37, %v2564_v37 }
 0x2b8   :  { %v2560_v52 = vpop.f32.mrf.mxu1 }
 0x2b9   :  { %v2569_v19 = vpack.c.bf16 %v2565_v38, %v2565_v38 }
 0x2bb   :  { %2905 = vmatprep.mubr.bf16.mxu1 %v2569_v19 }
 0x2bc   :  { %2906 = vmatmul.mubr.bf16.vlgmr.msra.gmra.mxu1 %v2568_v42 }
 0x33c   :  { %v3305_v43 = vpop.f32.mrf.mxu0 }
 0x33e   :  { %v3306_v44 = vpop.f32.mrf.mxu0 }
 0x33f   :  { %v3307_v39 = vadd.f32 %v3306_v44, %v3305_v43 }
 0x340   :  { %v3308_v31 = vpop.f32.mrf.mxu0 }
 0x341   :  { %v2868_v47 = vadd.f32 %v3307_v39, %v3256_v9 }
 0x342   :  { %v3309_v36 = vpop.f32.mrf.mxu0 }
 0x37c   :  { %v3327_v45 = vpop.f32.mrf.mxu1 }
 0x37e   :  { %v3328_v46 = vpop.f32.mrf.mxu1 }
 0x37f   :  { %v3329_v48 = vadd.f32 %v3328_v46, %v3327_v45 }
 0x380   :  { %v3330_v49 = vpop.f32.mrf.mxu1 }
 0x381   :  { %v2908_v50 = vadd.f32 %v3329_v48, %v2868_v47 }
 0x382   :  { %v3331_v51 = vpop.f32.mrf.mxu1 }
 0x383   :  { %2913 = vst [vmem:[#allocation7] sm:$0xff] %v2908_v50 }
 0x384   :  { %3908 = shalt.err (!%p3905_p0)
}
 0x385   :  { %2923 = dma.vmem_to_hbm [thread:$0]  %s2921_s13, 128, %s4185_s7, [#allocation4]  }
 0x386   :  { %3921 = dma.done.wait [#allocation4], 128  }
 0x387   :  { %3922 = vsyncadd [#allocation4], 4294967168 }
 0x388   :  { %2927 = vsyncpa [#allocation3], 1 }
 0x389   :  { %2928 = vsyncpa [#allocation6], 1 }
 0x38a   :  { %2929 = vsyncpa [#allocation4], 1 }

</bundles_post_ra>
